<compile_context>
chip_gen: v5e
topology: v5e:2x2
jax: 0.10.0
libtpu: 0.0.40
codegen_flags: <defaults>
</compile_context>

<pallas_src>
import jax
import jax.numpy as jnp
import numpy as np
from jax.experimental import pallas as pl
from jax.experimental.pallas import tpu as pltpu

MAX_K = 32
HID = 32 * 4          # lambda_net_hid_size * 4 = 128
LANE = 128
MAX_TILE_LANES = 1024  # max columns (rows of B*S) per grid step


def _round_up(x, m):
    return (x + m - 1) // m * m


def _mu_kernel(lower_ref, vals_ref, dist_ref, w1d_ref, w1c_ref, b1_ref,
               w2_ref, b2_ref, out_ref):
    """One column tile of sigmoid(W2 tanh(W1 [dist; counts] + b1) + b2).

    Feature-major layout: the B*S row axis (TN) sits on lanes everywhere.

      lower_ref : (K, K, 1) f32  1.0 where jp <  j (strict lower positional mask)
      vals_ref  : (K, TN)  int32 retrieved token ids
      dist_ref  : (K, TN)  f32   knn distances
      w1d_ref   : (H, K)   f32   first-layer weights acting on distances
      w1c_ref   : (H, K)   f32   first-layer count-weights, prefix-sum folded in
      b1_ref    : (H, 1)   f32
      w2_ref    : (1, H)   f32
      b2_ref    : (1, 1)   f32
      out_ref   : (1, TN)  f32   (lane-dense output block)
    """
    vals = vals_ref[...]            # (K, TN) int32
    dist = dist_ref[...]            # (K, TN) f32

    # ---- distinct-nonzero-label detection (== _get_label_count_segment) ----
    # eq[jp, j, n] = vals[jp, n] == vals[j, n]; position j is a duplicate if
    # any earlier position jp < j holds the same label.  compare + select
    # against the resident strict-lower mask + sum over the jp (outer) axis,
    # with the row axis on lanes so every op uses full 128-lane vregs.
    eq = vals[:, None, :] == vals[None, :, :]            # (K, K, TN) bool
    contrib = jnp.where(eq, lower_ref[...], 0.0)         # (K, K, TN) f32
    dup_cnt = jnp.sum(contrib, axis=0)                   # (K, TN)    f32

    # new non-zero label at position j (label id 0 never counts, as in torch).
    new_nz = jnp.where(jnp.logical_and(vals != 0, dup_cnt == 0.0), 1.0, 0.0)

    # ---- MLP: Linear(2K -> H) + Tanh + (Dropout p=0) + Linear(H -> 1) + Sigmoid
    # counts @ W1c == new_nz @ W1c_eff (running prefix sum folded into the
    # weights in the wrapper), so new_nz feeds the MXU directly.
    h = jnp.tanh(
        jnp.dot(w1d_ref[...], dist, preferred_element_type=jnp.float32)
        + jnp.dot(w1c_ref[...], new_nz, preferred_element_type=jnp.float32)
        + b1_ref[...])                                   # (H, TN)
    logit = jnp.dot(w2_ref[...], h,
                    preferred_element_type=jnp.float32) + b2_ref[...]
    out_ref[...] = jax.nn.sigmoid(logit)                 # (1, TN)


@jax.jit
def meta_k_network_forward(vals, distances, encoder_distances, params):
    """Pallas implementation of MetaKNetwork.forward (use_context_dis=False).

    Returns {'mu_net_output': (B, S, 1) float32}.
    encoder_distances is unused in this configuration (kept for API parity).
    """
    del encoder_distances  # not used when use_context_dis=False
    w1d, w1c, b1, w2, b2 = params
    B, S, K = vals.shape
    H = w1d.shape[1]
    N = B * S

    # ---- choose a lane tile: multiple of 128, at most 1024 columns ----
    n128 = _round_up(N, LANE) // LANE
    max_chunks = MAX_TILE_LANES // LANE
    if n128 <= max_chunks:
        tn = n128 * LANE                       # single tile, minimal padding
    else:
        # largest tile that divides the 128-padded width (no extra padding);
        # fall back to 1024 + padding if only tiny divisors exist.
        best = max(d for d in range(1, max_chunks + 1) if n128 % d == 0)
        tn = best * LANE if best >= 4 else MAX_TILE_LANES
    n_pad = _round_up(N, tn)
    grid = (n_pad // tn,)

    # Feature-major layout: rows (B*S) on the lane axis. Zero padding is
    # benign: vals=0 columns give counts=0, dist=0 columns give a finite
    # sigmoid; padded columns are sliced off the output below.
    vals_t = vals.reshape(N, K).astype(jnp.int32).T          # (K, N)
    dist_t = distances.reshape(N, K).astype(jnp.float32).T   # (K, N)
    if n_pad != N:
        vals_t = jnp.pad(vals_t, ((0, 0), (0, n_pad - N)))
        dist_t = jnp.pad(dist_t, ((0, 0), (0, n_pad - N)))

    # Fold the label-count prefix sum into the count-weights:
    #   counts @ w1c == new_nz @ w1c_eff,  w1c_eff[a] = sum_{b >= a} w1c[b]
    w1c_eff = jax.lax.cumsum(w1c.astype(jnp.float32), axis=0, reverse=True)
    w1d_t = w1d.astype(jnp.float32).T                        # (H, K)
    w1c_t = w1c_eff.T                                        # (H, K)
    b1_t = b1.astype(jnp.float32).reshape(1, H).T            # (H, 1)
    w2_t = w2.astype(jnp.float32).reshape(H, 1).T            # (1, H)
    b2_t = b2.astype(jnp.float32).reshape(1, 1)              # (1, 1)

    # Strict-lower positional mask, passed once, lane-broadcastable in-kernel.
    jp_idx = jax.lax.broadcasted_iota(jnp.int32, (K, K), 0)
    j_idx = jax.lax.broadcasted_iota(jnp.int32, (K, K), 1)
    lower3 = (jp_idx < j_idx).astype(jnp.float32)[:, :, None]  # (K, K, 1)

    out = pl.pallas_call(
        _mu_kernel,
        out_shape=jax.ShapeDtypeStruct((1, n_pad), jnp.float32),
        grid=grid,
        in_specs=[
            pl.BlockSpec((K, K, 1), lambda i: (0, 0, 0)),  # strict-lower mask
            pl.BlockSpec((K, tn), lambda i: (0, i)),       # vals   (tiled cols)
            pl.BlockSpec((K, tn), lambda i: (0, i)),       # dist   (tiled cols)
            pl.BlockSpec((H, K), lambda i: (0, 0)),        # w1d^T  (resident)
            pl.BlockSpec((H, K), lambda i: (0, 0)),        # w1c_eff^T (resident)
            pl.BlockSpec((H, 1), lambda i: (0, 0)),        # b1
            pl.BlockSpec((1, H), lambda i: (0, 0)),        # w2^T
            pl.BlockSpec((1, 1), lambda i: (0, 0)),        # b2
        ],
        out_specs=pl.BlockSpec((1, tn), lambda i: (0, i)), # lane-dense output
        compiler_params=pltpu.CompilerParams(
            dimension_semantics=("parallel",),              # 2 TCs on v7x
            vmem_limit_bytes=32 * 1024 * 1024),             # safe on v5e/v6e/v7x
    )(lower3, vals_t, dist_t, w1d_t, w1c_t, b1_t, w2_t, b2_t)

    return {'mu_net_output': out[0, :N].reshape(B, S, 1)}


def init_params(key, max_k=MAX_K, hid=HID):
    """Deterministic parameter init mirroring the module's __init__ shapes.

    Torch W1 is (hid, 2*max_k) with column-block-wise xavier_normal_
    (gain 0.01 for the distance block, 0.1 for the count block); W2 is (1, hid)
    with xavier_normal_. We store transposed (in, out) copies for the kernel.
    """
    k1, k2, k3, k4, k5 = jax.random.split(key, 5)
    std_d = 0.01 * np.sqrt(2.0 / (max_k + hid))   # xavier_normal, gain=0.01
    std_c = 0.1 * np.sqrt(2.0 / (max_k + hid))    # xavier_normal, gain=0.1
    std_2 = np.sqrt(2.0 / (hid + 1))              # xavier_normal, gain=1
    w1d = (std_d * jax.random.normal(k1, (max_k, hid))).astype(jnp.float32)
    w1c = (std_c * jax.random.normal(k2, (max_k, hid))).astype(jnp.float32)
    bound1 = 1.0 / np.sqrt(2 * max_k)
    b1 = jax.random.uniform(k3, (1, hid), jnp.float32, -bound1, bound1)
    w2 = (std_2 * jax.random.normal(k4, (hid, 1))).astype(jnp.float32)
    bound2 = 1.0 / np.sqrt(hid)
    b2 = jax.random.uniform(k5, (1, 1), jnp.float32, -bound2, bound2)
    return (w1d, w1c, b1, w2, b2)


def reference_forward(vals, distances, params):
    """Pure-JAX reference reproducing the PyTorch semantics."""
    w1d, w1c, b1, w2, b2 = params
    B, S, K = vals.shape
    v = vals.astype(jnp.int32)
    eq = v[..., :, None] == v[..., None, :]                    # (B,S,jp,j)
    jp_idx = jax.lax.broadcasted_iota(jnp.int32, (K, K), 0)
    j_idx = jax.lax.broadcasted_iota(jnp.int32, (K, K), 1)
    dup = jnp.any(jnp.logical_and(eq, (jp_idx < j_idx)), axis=-2)
    new_nz = jnp.logical_and(v != 0, jnp.logical_not(dup)).astype(jnp.float32)
    counts = jnp.cumsum(new_nz, axis=-1)                       # label counts
    h = jnp.tanh(distances.astype(jnp.float32) @ w1d + counts @ w1c + b1)
    return jax.nn.sigmoid(h @ w2 + b2)                         # (B, S, 1)


if __name__ == "__main__":
    key = jax.random.PRNGKey(0)
    k_vals, k_dist, k_enc, k_par, k_vals2, k_dist2 = jax.random.split(key, 6)
    params = init_params(k_par)

    # --- small test (single tile, lane padding 16 -> 128) ---
    B, S, K = 2, 8, MAX_K
    vals = jax.random.randint(k_vals, (B, S, K), 0, 20, dtype=jnp.int32)
    distances = jax.random.uniform(k_dist, (B, S, K), jnp.float32, 0.0, 10.0)
    encoder_distances = jax.random.uniform(k_enc, (B, S, K), jnp.float32)

    out = meta_k_network_forward(vals, distances, encoder_distances, params)
    mu = jax.block_until_ready(out['mu_net_output'])
    ref = jax.block_until_ready(reference_forward(vals, distances, params))
    assert mu.shape == (B, S, 1) and mu.dtype == jnp.float32
    np.testing.assert_allclose(np.asarray(mu), np.asarray(ref),
                               rtol=1e-5, atol=2e-5)

    # --- multi-tile test (exercises column tiling, grid>1 and padding) ---
    B2, S2 = 2, 600                     # N = 1200 -> tn = 640, 2 grid steps
    vals_b = jax.random.randint(k_vals2, (B2, S2, K), 0, 20, dtype=jnp.int32)
    dist_b = jax.random.uniform(k_dist2, (B2, S2, K), jnp.float32, 0.0, 10.0)
    enc_b = jnp.zeros((B2, S2, K), jnp.float32)

    out_b = meta_k_network_forward(vals_b, dist_b, enc_b, params)
    mu_b = jax.block_until_ready(out_b['mu_net_output'])
    ref_b = jax.block_until_ready(reference_forward(vals_b, dist_b, params))
    assert mu_b.shape == (B2, S2, 1)
    np.testing.assert_allclose(np.asarray(mu_b), np.asarray(ref_b),
                               rtol=1e-5, atol=2e-5)

    print("KERNEL_OK")
</pallas_src>

<mosaic_0001>
module attributes {stable_mosaic.version = 11 : i64} {
  func.func @_mu_kernel(%arg0: i32, %arg1: memref<32x32x1xf32, #tpu.memory_space<vmem>>, %arg2: memref<32x128xi32, #tpu.memory_space<vmem>>, %arg3: memref<32x128xf32, #tpu.memory_space<vmem>>, %arg4: memref<128x32xf32, #tpu.memory_space<vmem>>, %arg5: memref<128x32xf32, #tpu.memory_space<vmem>>, %arg6: memref<128x1xf32, #tpu.memory_space<vmem>>, %arg7: memref<1x128xf32, #tpu.memory_space<vmem>>, %arg8: memref<1x1xf32, #tpu.memory_space<vmem>>, %arg9: memref<1x128xf32, #tpu.memory_space<vmem>>) attributes {dimension_semantics = [#tpu.dimension_semantics<parallel>], iteration_bounds = array<i64: 1>, scalar_prefetch = 0 : i64, scratch_operands = 0 : i64, tpu.core_type = #tpu.core_type<tc>, window_params = [{pipeline_mode = #tpu.pipeline_mode<synchronous>, transform_indices = @transform_0, window_bounds = array<i64: 32, 32, 1>}, {transform_indices = @transform_1, window_bounds = array<i64: 32, 128>}, {transform_indices = @transform_2, window_bounds = array<i64: 32, 128>}, {pipeline_mode = #tpu.pipeline_mode<synchronous>, transform_indices = @transform_3, window_bounds = array<i64: 128, 32>}, {pipeline_mode = #tpu.pipeline_mode<synchronous>, transform_indices = @transform_4, window_bounds = array<i64: 128, 32>}, {pipeline_mode = #tpu.pipeline_mode<synchronous>, transform_indices = @transform_5, window_bounds = array<i64: 128, 1>}, {pipeline_mode = #tpu.pipeline_mode<synchronous>, transform_indices = @transform_6, window_bounds = array<i64: 1, 128>}, {pipeline_mode = #tpu.pipeline_mode<synchronous>, transform_indices = @transform_7, window_bounds = array<i64: 1, 1>}, {transform_indices = @transform_8, window_bounds = array<i64: 1, 128>}]} {
    %c0 = arith.constant 0 : index
    %c0_0 = arith.constant 0 : index
    %0 = vector.load %arg2[%c0, %c0_0] : memref<32x128xi32, #tpu.memory_space<vmem>>, vector<32x128xi32>
    %c0_1 = arith.constant 0 : index
    %c0_2 = arith.constant 0 : index
    %1 = vector.load %arg3[%c0_1, %c0_2] : memref<32x128xf32, #tpu.memory_space<vmem>>, vector<32x128xf32>
    %2 = vector.shape_cast %0 : vector<32x128xi32> to vector<32x1x128xi32>
    %3 = vector.shape_cast %0 : vector<32x128xi32> to vector<1x32x128xi32>
    %4 = vector.broadcast %2 : vector<32x1x128xi32> to vector<32x32x128xi32>
    %5 = vector.broadcast %3 : vector<1x32x128xi32> to vector<32x32x128xi32>
    %6 = arith.cmpi eq, %4, %5 : vector<32x32x128xi32>
    %c0_3 = arith.constant 0 : index
    %c0_4 = arith.constant 0 : index
    %c0_5 = arith.constant 0 : index
    %7 = vector.load %arg1[%c0_3, %c0_4, %c0_5] : memref<32x32x1xf32, #tpu.memory_space<vmem>>, vector<32x32x1xf32>
    %cst = arith.constant 0.000000e+00 : f32
    %8 = vector.shape_cast %7 : vector<32x32x1xf32> to vector<32x32x1xf32>
    %9 = vector.broadcast %8 : vector<32x32x1xf32> to vector<32x32x128xf32>
    %10 = vector.broadcast %cst : f32 to vector<32x32x128xf32>
    %11 = arith.select %6, %9, %10 : vector<32x32x128xi1>, vector<32x32x128xf32>
    %cst_6 = arith.constant dense<0.000000e+00> : vector<32x128xf32>
    %12 = vector.multi_reduction <add>, %11, %cst_6 [0] : vector<32x32x128xf32> to vector<32x128xf32>
    %c0_i32 = arith.constant 0 : i32
    %13 = vector.broadcast %c0_i32 : i32 to vector<32x128xi32>
    %14 = arith.cmpi ne, %0, %13 : vector<32x128xi32>
    %cst_7 = arith.constant 0.000000e+00 : f32
    %15 = vector.broadcast %cst_7 : f32 to vector<32x128xf32>
    %16 = arith.cmpf oeq, %12, %15 : vector<32x128xf32>
    %17 = arith.andi %14, %16 : vector<32x128xi1>
    %cst_8 = arith.constant 1.000000e+00 : f32
    %cst_9 = arith.constant 0.000000e+00 : f32
    %18 = vector.broadcast %cst_8 : f32 to vector<32x128xf32>
    %19 = vector.broadcast %cst_9 : f32 to vector<32x128xf32>
    %20 = arith.select %17, %18, %19 : vector<32x128xi1>, vector<32x128xf32>
    %c0_10 = arith.constant 0 : index
    %c0_11 = arith.constant 0 : index
    %21 = vector.load %arg4[%c0_10, %c0_11] : memref<128x32xf32, #tpu.memory_space<vmem>>, vector<128x32xf32>
    %cst_12 = arith.constant dense<0.000000e+00> : vector<128x128xf32>
    %22 = tpu.matmul %21, %1, %cst_12 {dimension_numbers = #tpu.dot_dimension_numbers<[1], [0], [0], [1], [0, 0, 1, 1], [], []>} : vector<128x32xf32>, vector<32x128xf32>, vector<128x128xf32> -> vector<128x128xf32>
    %c0_13 = arith.constant 0 : index
    %c0_14 = arith.constant 0 : index
    %23 = vector.load %arg5[%c0_13, %c0_14] : memref<128x32xf32, #tpu.memory_space<vmem>>, vector<128x32xf32>
    %cst_15 = arith.constant dense<0.000000e+00> : vector<128x128xf32>
    %24 = tpu.matmul %23, %20, %cst_15 {dimension_numbers = #tpu.dot_dimension_numbers<[1], [0], [0], [1], [0, 0, 1, 1], [], []>} : vector<128x32xf32>, vector<32x128xf32>, vector<128x128xf32> -> vector<128x128xf32>
    %25 = arith.addf %22, %24 : vector<128x128xf32>
    %c0_16 = arith.constant 0 : index
    %c0_17 = arith.constant 0 : index
    %26 = vector.load %arg6[%c0_16, %c0_17] : memref<128x1xf32, #tpu.memory_space<vmem>>, vector<128x1xf32>
    %27 = vector.broadcast %26 : vector<128x1xf32> to vector<128x128xf32>
    %28 = arith.addf %25, %27 : vector<128x128xf32>
    %29 = math.tanh %28 : vector<128x128xf32>
    %c0_18 = arith.constant 0 : index
    %c0_19 = arith.constant 0 : index
    %30 = vector.load %arg7[%c0_18, %c0_19] : memref<1x128xf32, #tpu.memory_space<vmem>>, vector<1x128xf32>
    %cst_20 = arith.constant dense<0.000000e+00> : vector<1x128xf32>
    %31 = tpu.matmul %30, %29, %cst_20 {dimension_numbers = #tpu.dot_dimension_numbers<[1], [0], [0], [1], [0, 0, 1, 1], [], []>} : vector<1x128xf32>, vector<128x128xf32>, vector<1x128xf32> -> vector<1x128xf32>
    %c0_21 = arith.constant 0 : index
    %c0_22 = arith.constant 0 : index
    %32 = vector.load %arg8[%c0_21, %c0_22] : memref<1x1xf32, #tpu.memory_space<vmem>>, vector<1x1xf32>
    %33 = vector.broadcast %32 : vector<1x1xf32> to vector<1x128xf32>
    %34 = arith.addf %31, %33 : vector<1x128xf32>
    %35 = arith.negf %34 : vector<1x128xf32>
    %36 = math.exp %35 : vector<1x128xf32>
    %cst_23 = arith.constant 1.000000e+00 : f32
    %37 = vector.broadcast %cst_23 : f32 to vector<1x128xf32>
    %38 = arith.addf %37, %36 : vector<1x128xf32>
    %39 = arith.divf %37, %38 : vector<1x128xf32>
    %c0_24 = arith.constant 0 : index
    %c0_25 = arith.constant 0 : index
    %40 = vector.load %arg9[%c0_24, %c0_25] : memref<1x128xf32, #tpu.memory_space<vmem>>, vector<1x128xf32>
    tpu.vector_store %arg9[%c0_24, %c0_25], %39 {strides = array<i32>} : memref<1x128xf32, #tpu.memory_space<vmem>>, vector<1x128xf32>,
    return
  }
  func.func @transform_0(%arg0: i32) -> (i32, i32, i32) {
    %c0_i32 = arith.constant 0 : i32
    %c0_i32_0 = arith.constant 0 : i32
    %c0_i32_1 = arith.constant 0 : i32
    %c0_i32_2 = arith.constant 0 : i32
    return %c0_i32, %c0_i32_0, %c0_i32_1 : i32, i32, i32
  }
  func.func @transform_1(%arg0: i32) -> (i32, i32) {
    %c0_i32 = arith.constant 0 : i32
    %c0_i32_0 = arith.constant 0 : i32
    return %c0_i32, %arg0 : i32, i32
  }
  func.func @transform_2(%arg0: i32) -> (i32, i32) {
    %c0_i32 = arith.constant 0 : i32
    %c0_i32_0 = arith.constant 0 : i32
    return %c0_i32, %arg0 : i32, i32
  }
  func.func @transform_3(%arg0: i32) -> (i32, i32) {
    %c0_i32 = arith.constant 0 : i32
    %c0_i32_0 = arith.constant 0 : i32
    %c0_i32_1 = arith.constant 0 : i32
    return %c0_i32, %c0_i32_0 : i32, i32
  }
  func.func @transform_4(%arg0: i32) -> (i32, i32) {
    %c0_i32 = arith.constant 0 : i32
    %c0_i32_0 = arith.constant 0 : i32
    %c0_i32_1 = arith.constant 0 : i32
    return %c0_i32, %c0_i32_0 : i32, i32
  }
  func.func @transform_5(%arg0: i32) -> (i32, i32) {
    %c0_i32 = arith.constant 0 : i32
    %c0_i32_0 = arith.constant 0 : i32
    %c0_i32_1 = arith.constant 0 : i32
    return %c0_i32, %c0_i32_0 : i32, i32
  }
  func.func @transform_6(%arg0: i32) -> (i32, i32) {
    %c0_i32 = arith.constant 0 : i32
    %c0_i32_0 = arith.constant 0 : i32
    %c0_i32_1 = arith.constant 0 : i32
    return %c0_i32, %c0_i32_0 : i32, i32
  }
  func.func @transform_7(%arg0: i32) -> (i32, i32) {
    %c0_i32 = arith.constant 0 : i32
    %c0_i32_0 = arith.constant 0 : i32
    %c0_i32_1 = arith.constant 0 : i32
    return %c0_i32, %c0_i32_0 : i32, i32
  }
  func.func @transform_8(%arg0: i32) -> (i32, i32) {
    %c0_i32 = arith.constant 0 : i32
    %c0_i32_0 = arith.constant 0 : i32
    return %c0_i32, %arg0 : i32, i32
  }
}

</mosaic_0001>

<bundles_post_ra>
// kernel: squeeze.1
= control target key start
LH: loop header
LB: loop body
LE: loop exit
PB: predicated region body
PF: predicated region fallthrough
CT: control target
= control target key end

     0   :  { %s80_s0 = inlined_call_operand.vmem [shape: f32[16], index: 0, kind: input, shape index: {}]   ;;  %s81_s1 = inlined_call_operand.hbm [shape: f32[2,8,1], index: 1, kind: output, shape index: {}]  }
   0x1   :  { %v5_v0 = vld [vmem:[%s80_s0] sm:$0x1] }
   0x2   :  { %2 = vsyncpa [#allocation1], 0  ;;  %6 = vst [vmem:[#allocation3] sm:$0x1] %v5_v0  ;;  %vm8_vm0 = vcmask 64512   ;;  %s62_s0 = smov 120  }
   0x3   :  { %s63_s8 = smov [#allocation0]   ;;  %s27_s1 = sshll.u32 %s81_s1, 4  ;;  %s28_s1 = int_to_ptr.hbm [resolvable:$true] %s27_s1 }
   0x4   :  { %s25_s9 = sshll.u32 %s63_s8, 4  ;;  %s26_s9 = int_to_ptr.vmem [resolvable:$true] %s25_s9 }
   0x9   :  { %v10_v1 = vld [vmem:[#allocation3] sm:$0x1]  }
   0xa   :  { %v7_v2 = vld [vmem:[#allocation3] sm:$0x1]   ;;  %11 = vrot.lane.b32.xlu0 %v10_v1, %s62_s0 }
   0xb   :  { %9 = vst.msk [vmem:[#allocation2] sm:$0x1] %vm8_vm0, %v7_v2  }
  0x7c   :  { %v12_v3 = vpop.permute.xlu0 %11  }
  0x7d   :  { %15 = vst.msk [vmem:[#allocation2 + $0x1] sm:$0x1] %vm8_vm0, %v12_v3  }
  0x84   :  { %v18_v4 = vld [vmem:[#allocation2] sm:$0x3] }
  0x85   :  { %21 = vst [vmem:[#allocation0] sm:$0x3] %v18_v4 }
  0x86   :  { %30 = dma.vmem_to_hbm [thread:$0]  %s26_s9, 32, %s28_s1, [#allocation1]  }
  0x87   :  { %60 = dma.done.wait [#allocation1], 32  }
  0x88   :  { %61 = vsyncadd [#allocation1], 4294967264 }
  0x89   :  { %33 = vsyncpa [#allocation1], 1 }

// kernel: meta_k_network_forward.1
= control target key start
LH: loop header
LB: loop body
LE: loop exit
PB: predicated region body
PF: predicated region fallthrough
CT: control target
= control target key end

     0   :  { %v1792_v0 = vmov 0   ;;  %s2870_s0 = inlined_call_operand.vmem [shape: f32[32,32,1], index: 0, kind: input, shape index: {}]   ;;  %s2871_s1 = inlined_call_operand.vmem [shape: s32[32,128], index: 1, kind: input, shape index: {}]   ;;  %s2872_s5 = inlined_call_operand.vmem [shape: f32[128,1], index: 5, kind: input, shape index: {}]   ;;  %s2873_s7 = inlined_call_operand.<no memory space> [shape: f32[1,1], index: 7, kind: input, shape index: {}]   ;;  %s2874_s2 = inlined_call_operand.vmem [shape: f32[32,128], index: 2, kind: input, shape index: {}]   ;;  %s2875_s3 = inlined_call_operand.vmem [shape: f32[128,32], index: 3, kind: input, shape index: {}]   ;;  %s2876_s4 = inlined_call_operand.vmem [shape: f32[128,32], index: 4, kind: input, shape index: {}]   ;;  %s2877_s6 = inlined_call_operand.vmem [shape: f32[1,128], index: 6, kind: input, shape index: {}]   ;;  %s2878_s8 = inlined_call_operand.vmem [shape: f32[1,128], index: 8, kind: output, shape index: {}]  }
   0x1   :  { %1751 = vset.pattern.permute.xlu2 %v1792_v0  ;;  %1750 = vset.pattern.permute.xlu1 %v1792_v0  ;;  %v231_v1 = vld [vmem:[%s2870_s0 + $0x20] sm:$0xff]  ;;  %v229_v2 = vld [vmem:[%s2870_s0 + $0x10] sm:$0xff]  ;;  %v232_v4 = vld [vmem:[%s2870_s0 + $0x28] sm:$0xff] }
   0x2   :  { %v227_v3 = vld [vmem:[%s2870_s0] sm:$0xff]  ;;  %1749 = vset.pattern.permute.xlu0 %v1792_v0  ;;  %377 = vperm.xlu2 %1751, %v231_v1   ;;  %v230_v5 = vld [vmem:[%s2870_s0 + $0x18] sm:$0xff]  ;;  %v228_v6 = vld [vmem:[%s2870_s0 + $0x8] sm:$0xff] }
   0x3   :  { %367 = vperm.xlu1 %1750, %v229_v2   ;;  %357 = vperm.xlu0 %1749, %v227_v3   ;;  %v235_v7 = vld [vmem:[%s2870_s0 + $0x40] sm:$0xff]  ;;  %v234_v8 = vld [vmem:[%s2870_s0 + $0x38] sm:$0xff]  ;;  %v233_v9 = vld [vmem:[%s2870_s0 + $0x30] sm:$0xff] }
   0x4   :  { %v238_v10 = vld [vmem:[%s2870_s0 + $0x58] sm:$0xff]  ;;  %v237_v11 = vld [vmem:[%s2870_s0 + $0x50] sm:$0xff]  ;;  %v236_v12 = vld [vmem:[%s2870_s0 + $0x48] sm:$0xff] }
   0x5   :  { %v241_v13 = vld [vmem:[%s2870_s0 + $0x70] sm:$0xff]  ;;  %v240_v14 = vld [vmem:[%s2870_s0 + $0x68] sm:$0xff]  ;;  %v239_v15 = vld [vmem:[%s2870_s0 + $0x60] sm:$0xff] }
   0x6   :  { %v244_v16 = vld [vmem:[%s2870_s0 + $0x88] sm:$0xff]  ;;  %v243_v17 = vld [vmem:[%s2870_s0 + $0x80] sm:$0xff]  ;;  %v242_v18 = vld [vmem:[%s2870_s0 + $0x78] sm:$0xff] }
   0x7   :  { %v247_v19 = vld [vmem:[%s2870_s0 + $0xa0] sm:$0xff]  ;;  %v246_v20 = vld [vmem:[%s2870_s0 + $0x98] sm:$0xff]  ;;  %v245_v21 = vld [vmem:[%s2870_s0 + $0x90] sm:$0xff] }
   0x8   :  { %v250_v22 = vld [vmem:[%s2870_s0 + $0xb8] sm:$0xff]  ;;  %v249_v23 = vld [vmem:[%s2870_s0 + $0xb0] sm:$0xff]  ;;  %v248_v24 = vld [vmem:[%s2870_s0 + $0xa8] sm:$0xff] }
   0x9   :  { %v253_v25 = vld [vmem:[%s2870_s0 + $0xd0] sm:$0xff]  ;;  %v252_v26 = vld [vmem:[%s2870_s0 + $0xc8] sm:$0xff]  ;;  %v251_v27 = vld [vmem:[%s2870_s0 + $0xc0] sm:$0xff] }
   0xa   :  { %382 = vperm.xlu2 %1751, %v232_v4   ;;  %v256_v28 = vld [vmem:[%s2870_s0 + $0xe8] sm:$0xff]  ;;  %v255_v29 = vld [vmem:[%s2870_s0 + $0xe0] sm:$0xff]  ;;  %v254_v30 = vld [vmem:[%s2870_s0 + $0xd8] sm:$0xff] }
   0xb   :  { %372 = vperm.xlu1 %1750, %v230_v5   ;;  %362 = vperm.xlu0 %1749, %v228_v6   ;;  %v259_v31 = vld [vmem:[%s2870_s0 + $0x100] sm:$0xff]  ;;  %v258_v32 = vld [vmem:[%s2870_s0 + $0xf8] sm:$0xff]  ;;  %v257_v33 = vld [vmem:[%s2870_s0 + $0xf0] sm:$0xff] }
   0xc   :  { %v262_v34 = vld [vmem:[%s2870_s0 + $0x118] sm:$0xff]  ;;  %v261_v35 = vld [vmem:[%s2870_s0 + $0x110] sm:$0xff]  ;;  %v260_v36 = vld [vmem:[%s2870_s0 + $0x108] sm:$0xff] }
   0xd   :  { %v265_v38 = vld [vmem:[%s2870_s0 + $0x130] sm:$0xff]  ;;  %v264_v39 = vld [vmem:[%s2870_s0 + $0x128] sm:$0xff]  ;;  %v263_v40 = vld [vmem:[%s2870_s0 + $0x120] sm:$0xff] }
   0xe   :  { %v1959_v42 = vld [vmem:[%s2871_s1] sm:$0xff]  ;;  %v268_v43 = vld [vmem:[%s2870_s0 + $0x148] sm:$0xff]  ;;  %v266_v45 = vld [vmem:[%s2870_s0 + $0x138] sm:$0xff] }
   0xf   :  { %v267_v44 = vld [vmem:[%s2870_s0 + $0x140] sm:$0xff]  ;;  %v39_v46 = vrot.slane %v1959_v42, 1  ;;  %v40_v47 = vrot.slane %v1959_v42, 2  ;;  %v67_v52 = vperm.slane %v1959_v42, 0  ;;  %v270_v53 = vld [vmem:[%s2870_s0 + $0x158] sm:$0xff]  ;;  %v269_v54 = vld [vmem:[%s2870_s0 + $0x150] sm:$0xff] }
  0x10   :  { %v271_v51 = vld [vmem:[%s2870_s0 + $0x160] sm:$0xff]  ;;  %v1991_v59 = vld [vmem:[%s2871_s1 + $0x8] sm:$0xff]  ;;  %v274_v63 = vld [vmem:[%s2870_s0 + $0x178] sm:$0xff] }
  0x11   :  { %v68_v49 = vperm.slane %v39_v46, 0  ;;  %v1972_v50 = vperm.slane %v40_v47, 0  ;;  %vm99_vm2 = vcmp.eq.s32.totalorder %v67_v52, %v1959_v42  ;;  %v273_v0 = vld [vmem:[%s2870_s0 + $0x170] sm:$0xff]  ;;  %v272_v1 = vld [vmem:[%s2870_s0 + $0x168] sm:$0xff]  ;;  %vm100_vm4 = vcmp.eq.s32.totalorder %v67_v52, %v1991_v59 }
  0x12   :  { %397 = vperm.xlu2 %1751, %v235_v7   ;;  %v43_v46 = vrot.slane %v1959_v42, 5 }
  0x13   :  { %392 = vperm.xlu1 %1750, %v234_v8   ;;  %387 = vperm.xlu0 %1749, %v233_v9   ;;  %vm103_vm0 = vcmp.eq.s32.totalorder %v68_v49, %v1959_v42  ;;  %vm107_vm1 = vcmp.eq.s32.totalorder %v1972_v50, %v1959_v42  ;;  %vm104_vm3 = vcmp.eq.s32.totalorder %v68_v49, %v1991_v59  ;;  %v2009_v8 = vld [vmem:[%s2871_s1 + $0x10] sm:$0xff] }
  0x14   :  { %vm101_vm5 = vcmp.eq.s32.totalorder %v67_v52, %v2009_v8  ;;  %vm105_vm8 = vcmp.eq.s32.totalorder %v68_v49, %v2009_v8  ;;  %vm109_vm10 = vcmp.eq.s32.totalorder %v1972_v50, %v2009_v8  ;;  %vm108_vm11 = vcmp.eq.s32.totalorder %v1972_v50, %v1991_v59 }
  0x1a   :  { %412 = vperm.xlu2 %1751, %v238_v10   ;;  %v277_v10 = vld [vmem:[%s2870_s0 + $0x190] sm:$0xff] }
  0x1b   :  { %407 = vperm.xlu1 %1750, %v237_v11   ;;  %402 = vperm.xlu0 %1749, %v236_v12   ;;  %v2017_v11 = vld [vmem:[%s2871_s1 + $0x18] sm:$0xff]  ;;  %v276_v12 = vld [vmem:[%s2870_s0 + $0x188] sm:$0xff] }
  0x1c   :  { %vm102_vm6 = vcmp.eq.s32.totalorder %v67_v52, %v2017_v11  ;;  %vm106_vm7 = vcmp.eq.s32.totalorder %v68_v49, %v2017_v11  ;;  %vm110_vm9 = vcmp.eq.s32.totalorder %v1972_v50, %v2017_v11 }
  0x22   :  { %427 = vperm.xlu2 %1751, %v241_v13   ;;  %v275_v13 = vld [vmem:[%s2870_s0 + $0x180] sm:$0xff] }
  0x23   :  { %422 = vperm.xlu1 %1750, %v240_v14   ;;  %417 = vperm.xlu0 %1749, %v239_v15   ;;  %v41_v15 = vrot.slane %v1959_v42, 3 }
  0x2a   :  { %442 = vperm.xlu2 %1751, %v244_v16  }
  0x2b   :  { %437 = vperm.xlu1 %1750, %v243_v17   ;;  %432 = vperm.xlu0 %1749, %v242_v18  }
  0x32   :  { %457 = vperm.xlu2 %1751, %v247_v19  }
  0x33   :  { %452 = vperm.xlu1 %1750, %v246_v20   ;;  %447 = vperm.xlu0 %1749, %v245_v21  }
  0x3a   :  { %472 = vperm.xlu2 %1751, %v250_v22  }
  0x3b   :  { %467 = vperm.xlu1 %1750, %v249_v23   ;;  %462 = vperm.xlu0 %1749, %v248_v24   ;;  %v280_v24 = vld [vmem:[%s2870_s0 + $0x1a8] sm:$0xff] }
  0x42   :  { %487 = vperm.xlu2 %1751, %v253_v25  }
  0x43   :  { %482 = vperm.xlu1 %1750, %v252_v26   ;;  %477 = vperm.xlu0 %1749, %v251_v27   ;;  %v279_v26 = vld [vmem:[%s2870_s0 + $0x1a0] sm:$0xff]  ;;  %v278_v27 = vld [vmem:[%s2870_s0 + $0x198] sm:$0xff] }
  0x4a   :  { %502 = vperm.xlu2 %1751, %v256_v28   ;;  %v70_v28 = vperm.slane %v41_v15, 0 }
  0x4b   :  { %497 = vperm.xlu1 %1750, %v255_v29   ;;  %492 = vperm.xlu0 %1749, %v254_v30  }
  0x4c   :  { %vm113_vm12 = vcmp.eq.s32.totalorder %v70_v28, %v2009_v8  ;;  %vm112_vm13 = vcmp.eq.s32.totalorder %v70_v28, %v1991_v59  ;;  %vm111_vm14 = vcmp.eq.s32.totalorder %v70_v28, %v1959_v42 }
  0x52   :  { %517 = vperm.xlu2 %1751, %v259_v31   ;;  %v42_v31 = vrot.slane %v1959_v42, 4 }
  0x53   :  { %512 = vperm.xlu1 %1750, %v258_v32   ;;  %507 = vperm.xlu0 %1749, %v257_v33  }
  0x5a   :  { %532 = vperm.xlu2 %1751, %v262_v34  }
  0x5b   :  { %527 = vperm.xlu1 %1750, %v261_v35   ;;  %522 = vperm.xlu0 %1749, %v260_v36  }
  0x5c   :  { %v378_v37 = vpop.permute.xlu2 %377 }
  0x5d   :  { %v999_v55 = vsel %vm103_vm0, %v378_v37, 0.0 }
  0x62   :  { %547 = vperm.xlu2 %1751, %v265_v38   ;;  %v283_v38 = vld [vmem:[%s2870_s0 + $0x1c0] sm:$0xff] }
  0x63   :  { %542 = vperm.xlu1 %1750, %v264_v39   ;;  %537 = vperm.xlu0 %1749, %v263_v40   ;;  %v282_v40 = vld [vmem:[%s2870_s0 + $0x1b8] sm:$0xff] }
  0x64   :  { %v383_v41 = vpop.permute.xlu2 %382 }
  0x65   :  { %v1000_v3 = vsel %vm104_vm3, %v383_v41, 0.0  ;;  %v281_v41 = vld [vmem:[%s2870_s0 + $0x1b0] sm:$0xff] }
  0x6a   :  { %562 = vperm.xlu2 %1751, %v268_v43   ;;  %v71_v43 = vperm.slane %v42_v31, 0 }
  0x6b   :  { %557 = vperm.xlu1 %1750, %v267_v44   ;;  %552 = vperm.xlu0 %1749, %v266_v45  }
  0x6c   :  { %v398_v48 = vpop.permute.xlu2 %397  ;;  %vm116_vm15 = vcmp.eq.s32.totalorder %v71_v43, %v1991_v59  ;;  %vm115_vm0 = vcmp.eq.s32.totalorder %v71_v43, %v1959_v42  ;;  %vm118_vm3 = vcmp.eq.s32.totalorder %v71_v43, %v2017_v11 }
  0x6d   :  { %v1003_v60 = vsel %vm107_vm1, %v398_v48, 0.0  ;;  %vm114_vm1 = vcmp.eq.s32.totalorder %v70_v28, %v2017_v11 }
  0x72   :  { %577 = vperm.xlu2 %1751, %v271_v51  }
  0x73   :  { %572 = vperm.xlu1 %1750, %v270_v53   ;;  %567 = vperm.xlu0 %1749, %v269_v54   ;;  %v286_v53 = vld [vmem:[%s2870_s0 + $0x1d8] sm:$0xff] }
  0x74   :  { %v413_v56 = vpop.permute.xlu2 %412 }
  0x75   :  { %v368_v57 = vpop.permute.xlu1 %367  ;;  %v358_v58 = vpop.permute.xlu0 %357  ;;  %v1006_v25 = vsel %vm110_vm9, %v413_v56, 0.0  ;;  %v284_v56 = vld [vmem:[%s2870_s0 + $0x1c8] sm:$0xff] }
  0x76   :  { %v995_v61 = vsel %vm99_vm2, %v358_v58, 0.0  ;;  %v997_v18 = vsel %vm101_vm5, %v368_v57, 0.0  ;;  %v72_v57 = vperm.slane %v43_v46, 0  ;;  %v296_v46 = vld [vmem:[%s2870_s0 + $0x228] sm:$0xff] }
  0x77   :  { %v1123_v62 = vadd.f32 %v999_v55, %v995_v61  ;;  %v285_v55 = vld [vmem:[%s2870_s0 + $0x1d0] sm:$0xff] }
  0x78   :  { %vm119_vm2 = vcmp.eq.s32.totalorder %v72_v57, %v1959_v42  ;;  %vm122_vm5 = vcmp.eq.s32.totalorder %v72_v57, %v2017_v11 }
  0x79   :  { %v2003_v2 = vadd.f32 %v1123_v62, %v1003_v60 }
  0x7a   :  { %592 = vperm.xlu2 %1751, %v274_v63  }
  0x7b   :  { %587 = vperm.xlu1 %1750, %v273_v0   ;;  %582 = vperm.xlu0 %1749, %v272_v1  }
  0x7c   :  { %v428_v4 = vpop.permute.xlu2 %427 }
  0x7d   :  { %v373_v5 = vpop.permute.xlu1 %372  ;;  %v363_v6 = vpop.permute.xlu0 %362  ;;  %v1009_v39 = vsel %vm113_vm12, %v428_v4, 0.0 }
  0x7e   :  { %v996_v7 = vsel %vm100_vm4, %v363_v6, 0.0  ;;  %v998_v19 = vsel %vm102_vm6, %v373_v5, 0.0  ;;  %v288_v5 = vld [vmem:[%s2870_s0 + $0x1e8] sm:$0xff]  ;;  %v287_v6 = vld [vmem:[%s2870_s0 + $0x1e0] sm:$0xff]  ;;  %vm117_vm4 = vcmp.eq.s32.totalorder %v71_v43, %v2009_v8  ;;  %vm121_vm6 = vcmp.eq.s32.totalorder %v72_v57, %v2009_v8 }
  0x7f   :  { %v1154_v9 = vadd.f32 %v1000_v3, %v996_v7  ;;  %v289_v3 = vld [vmem:[%s2870_s0 + $0x1f0] sm:$0xff] }
  0x82   :  { %607 = vperm.xlu2 %1751, %v277_v10   ;;  %v44_v10 = vrot.slane %v1959_v42, 6 }
  0x83   :  { %602 = vperm.xlu1 %1750, %v276_v12   ;;  %597 = vperm.xlu0 %1749, %v275_v13  }
  0x84   :  { %v443_v14 = vpop.permute.xlu2 %442 }
  0x85   :  { %v393_v16 = vpop.permute.xlu1 %392  ;;  %v388_v17 = vpop.permute.xlu0 %387  ;;  %v1012_v54 = vsel %vm116_vm15, %v443_v14, 0.0 }
  0x86   :  { %v1002_v20 = vsel %vm106_vm7, %v393_v16, 0.0  ;;  %v1001_v21 = vsel %vm105_vm8, %v388_v17, 0.0  ;;  %vm120_vm7 = vcmp.eq.s32.totalorder %v72_v57, %v1991_v59 }
  0x87   :  { %v1216_v22 = vadd.f32 %v1002_v20, %v998_v19  ;;  %v1185_v23 = vadd.f32 %v1001_v21, %v997_v18  ;;  %v292_v18 = vld [vmem:[%s2870_s0 + $0x208] sm:$0xff]  ;;  %v291_v20 = vld [vmem:[%s2870_s0 + $0x200] sm:$0xff]  ;;  %v290_v21 = vld [vmem:[%s2870_s0 + $0x1f8] sm:$0xff] }
  0x89   :  { %v1217_v29 = vadd.f32 %v1216_v22, %v1006_v25  ;;  %v73_v22 = vperm.slane %v44_v10, 0  ;;  %v45_v25 = vrot.slane %v1959_v42, 7  ;;  %v310_v10 = vld [vmem:[%s2870_s0 + $0x298] sm:$0xff] }
  0x8a   :  { %622 = vperm.xlu2 %1751, %v280_v24  }
  0x8b   :  { %617 = vperm.xlu1 %1750, %v279_v26   ;;  %612 = vperm.xlu0 %1749, %v278_v27   ;;  %vm125_vm8 = vcmp.eq.s32.totalorder %v73_v22, %v2009_v8  ;;  %vm124_vm9 = vcmp.eq.s32.totalorder %v73_v22, %v1991_v59 }
  0x8c   :  { %v458_v30 = vpop.permute.xlu2 %457 }
  0x8d   :  { %v408_v32 = vpop.permute.xlu1 %407  ;;  %v403_v33 = vpop.permute.xlu0 %402  ;;  %v1015_v4 = vsel %vm119_vm2, %v458_v30, 0.0 }
  0x8e   :  { %v1005_v34 = vsel %vm109_vm10, %v408_v32, 0.0  ;;  %v1004_v35 = vsel %vm108_vm11, %v403_v33, 0.0  ;;  %v298_v32 = vld [vmem:[%s2870_s0 + $0x238] sm:$0xff]  ;;  %vm123_vm10 = vcmp.eq.s32.totalorder %v73_v22, %v1959_v42 }
  0x8f   :  { %v1186_v36 = vadd.f32 %v1185_v23, %v1005_v34  ;;  %v1155_v37 = vadd.f32 %v1154_v9, %v1004_v35  ;;  %v294_v34 = vld [vmem:[%s2870_s0 + $0x218] sm:$0xff]  ;;  %v293_v35 = vld [vmem:[%s2870_s0 + $0x210] sm:$0xff] }
  0x91   :  { %v1187_v44 = vadd.f32 %v1186_v36, %v1009_v39  ;;  %v74_v36 = vperm.slane %v45_v25, 0  ;;  %v309_v25 = vld [vmem:[%s2870_s0 + $0x290] sm:$0xff] }
  0x92   :  { %637 = vperm.xlu2 %1751, %v283_v38  }
  0x93   :  { %632 = vperm.xlu1 %1750, %v282_v40   ;;  %627 = vperm.xlu0 %1749, %v281_v41   ;;  %vm128_vm11 = vcmp.eq.s32.totalorder %v74_v36, %v1991_v59  ;;  %vm127_vm12 = vcmp.eq.s32.totalorder %v74_v36, %v1959_v42  ;;  %vm130_vm15 = vcmp.eq.s32.totalorder %v74_v36, %v2017_v11 }
  0x94   :  { %v473_v45 = vpop.permute.xlu2 %472 }
  0x95   :  { %v423_v47 = vpop.permute.xlu1 %422  ;;  %v418_v48 = vpop.permute.xlu0 %417  ;;  %v1018_v19 = vsel %vm122_vm5, %v473_v45, 0.0 }
  0x96   :  { %v1008_v49 = vsel %vm112_vm13, %v423_v47, 0.0  ;;  %v1007_v50 = vsel %vm111_vm14, %v418_v48, 0.0  ;;  %v302_v48 = vld [vmem:[%s2870_s0 + $0x258] sm:$0xff]  ;;  %vm126_vm13 = vcmp.eq.s32.totalorder %v73_v22, %v2017_v11 }
  0x97   :  { %v1156_v51 = vadd.f32 %v1155_v37, %v1008_v49  ;;  %v1125_v52 = vadd.f32 %v2003_v2, %v1007_v50  ;;  %v297_v49 = vld [vmem:[%s2870_s0 + $0x230] sm:$0xff]  ;;  %v75_v50 = vperm.slane %v1991_v59, 0 }
  0x99   :  { %v1157_v58 = vadd.f32 %v1156_v51, %v1012_v54  ;;  %vm131_vm14 = vcmp.eq.s32.totalorder %v75_v50, %v1959_v42  ;;  %vm133_vm2 = vcmp.eq.s32.totalorder %v75_v50, %v2009_v8 }
  0x9a   :  { %652 = vperm.xlu2 %1751, %v286_v53  }
  0x9b   :  { %647 = vperm.xlu1 %1750, %v285_v55   ;;  %642 = vperm.xlu0 %1749, %v284_v56  }
  0x9c   :  { %v488_v60 = vpop.permute.xlu2 %487 }
  0x9d   :  { %v438_v61 = vpop.permute.xlu1 %437  ;;  %v433_v62 = vpop.permute.xlu0 %432  ;;  %v1021_v33 = vsel %vm125_vm8, %v488_v60, 0.0  ;;  %v295_v60 = vld [vmem:[%s2870_s0 + $0x220] sm:$0xff] }
  0x9e   :  { %v1011_v63 = vsel %vm115_vm0, %v438_v61, 0.0  ;;  %v1010_v0 = vsel %vm114_vm1, %v433_v62, 0.0  ;;  %v306_v62 = vld [vmem:[%s2870_s0 + $0x278] sm:$0xff]  ;;  %vm129_vm0 = vcmp.eq.s32.totalorder %v74_v36, %v2009_v8  ;;  %vm134_vm1 = vcmp.eq.s32.totalorder %v75_v50, %v2017_v11 }
  0x9f   :  { %v1126_v1 = vadd.f32 %v1125_v52, %v1011_v63  ;;  %v1218_v2 = vadd.f32 %v1217_v29, %v1010_v0  ;;  %v301_v63 = vld [vmem:[%s2870_s0 + $0x250] sm:$0xff] }
  0xa1   :  { %v1127_v7 = vadd.f32 %v1126_v1, %v1015_v4 }
  0xa2   :  { %667 = vperm.xlu2 %1751, %v289_v3  }
  0xa3   :  { %662 = vperm.xlu1 %1750, %v288_v5   ;;  %657 = vperm.xlu0 %1749, %v287_v6  }
  0xa4   :  { %v503_v9 = vpop.permute.xlu2 %502 }
  0xa5   :  { %v453_v12 = vpop.permute.xlu1 %452  ;;  %v448_v13 = vpop.permute.xlu0 %447  ;;  %v1024_v47 = vsel %vm128_vm11, %v503_v9, 0.0 }
  0xa6   :  { %v1014_v14 = vsel %vm118_vm3, %v453_v12, 0.0  ;;  %v1013_v15 = vsel %vm117_vm4, %v448_v13, 0.0  ;;  %v305_v13 = vld [vmem:[%s2870_s0 + $0x270] sm:$0xff]  ;;  %vm132_vm3 = vcmp.eq.s32.totalorder %v75_v50, %v1991_v59 }
  0xa7   :  { %v1219_v16 = vadd.f32 %v1218_v2, %v1014_v14  ;;  %v1188_v17 = vadd.f32 %v1187_v44, %v1013_v15  ;;  %v46_v2 = vrot.slane %v1991_v59, 1  ;;  %v300_v14 = vld [vmem:[%s2870_s0 + $0x248] sm:$0xff] }
  0xa9   :  { %v1220_v23 = vadd.f32 %v1219_v16, %v1018_v19  ;;  %v76_v15 = vperm.slane %v46_v2, 0 }
  0xaa   :  { %682 = vperm.xlu2 %1751, %v292_v18   ;;  %v47_v18 = vrot.slane %v1991_v59, 2 }
  0xab   :  { %677 = vperm.xlu1 %1750, %v291_v20   ;;  %672 = vperm.xlu0 %1749, %v290_v21   ;;  %vm137_vm4 = vcmp.eq.s32.totalorder %v76_v15, %v2009_v8  ;;  %vm136_vm5 = vcmp.eq.s32.totalorder %v76_v15, %v1991_v59 }
  0xac   :  { %v518_v24 = vpop.permute.xlu2 %517 }
  0xad   :  { %v468_v26 = vpop.permute.xlu1 %467  ;;  %v463_v27 = vpop.permute.xlu0 %462  ;;  %v1027_v61 = vsel %vm131_vm14, %v518_v24, 0.0 }
  0xae   :  { %v1017_v28 = vsel %vm121_vm6, %v468_v26, 0.0  ;;  %v1016_v29 = vsel %vm120_vm7, %v463_v27, 0.0  ;;  %v304_v27 = vld [vmem:[%s2870_s0 + $0x268] sm:$0xff]  ;;  %vm135_vm6 = vcmp.eq.s32.totalorder %v76_v15, %v1959_v42 }
  0xaf   :  { %v1189_v30 = vadd.f32 %v1188_v17, %v1017_v28  ;;  %v1158_v31 = vadd.f32 %v1157_v58, %v1016_v29  ;;  %v299_v28 = vld [vmem:[%s2870_s0 + $0x240] sm:$0xff]  ;;  %v77_v29 = vperm.slane %v47_v18, 0 }
  0xb1   :  { %v1190_v37 = vadd.f32 %v1189_v30, %v1021_v33  ;;  %vm140_vm7 = vcmp.eq.s32.totalorder %v77_v29, %v1991_v59  ;;  %vm139_vm8 = vcmp.eq.s32.totalorder %v77_v29, %v1959_v42  ;;  %vm142_vm11 = vcmp.eq.s32.totalorder %v77_v29, %v2017_v11 }
  0xb2   :  { %712 = vperm.xlu2 %1751, %v298_v32   ;;  %v48_v32 = vrot.slane %v1991_v59, 3 }
  0xb3   :  { %692 = vperm.xlu1 %1750, %v294_v34   ;;  %687 = vperm.xlu0 %1749, %v293_v35  }
  0xb4   :  { %v533_v38 = vpop.permute.xlu2 %532 }
  0xb5   :  { %v483_v39 = vpop.permute.xlu1 %482  ;;  %v478_v40 = vpop.permute.xlu0 %477  ;;  %v1030_v12 = vsel %vm134_vm1, %v533_v38, 0.0 }
  0xb6   :  { %v1020_v41 = vsel %vm124_vm9, %v483_v39, 0.0  ;;  %v1019_v43 = vsel %vm123_vm10, %v478_v40, 0.0  ;;  %v308_v39 = vld [vmem:[%s2870_s0 + $0x288] sm:$0xff]  ;;  %vm138_vm9 = vcmp.eq.s32.totalorder %v76_v15, %v2017_v11 }
  0xb7   :  { %v1159_v44 = vadd.f32 %v1158_v31, %v1020_v41  ;;  %v1128_v45 = vadd.f32 %v1127_v7, %v1019_v43  ;;  %v303_v41 = vld [vmem:[%s2870_s0 + $0x260] sm:$0xff]  ;;  %v314_v43 = vld [vmem:[%s2870_s0 + $0x2b8] sm:$0xff] }
  0xb9   :  { %v1160_v51 = vadd.f32 %v1159_v44, %v1024_v47  ;;  %v78_v44 = vperm.slane %v48_v32, 0 }
  0xba   :  { %702 = vperm.xlu2 %1751, %v296_v46  }
  0xbb   :  { %732 = vperm.xlu1 %1750, %v302_v48   ;;  %707 = vperm.xlu0 %1749, %v297_v49   ;;  %vm143_vm10 = vcmp.eq.s32.totalorder %v78_v44, %v1959_v42  ;;  %vm145_vm14 = vcmp.eq.s32.totalorder %v78_v44, %v2009_v8 }
  0xbc   :  { %v548_v52 = vpop.permute.xlu2 %547 }
  0xbd   :  { %v498_v53 = vpop.permute.xlu1 %497  ;;  %v493_v54 = vpop.permute.xlu0 %492  ;;  %v1033_v26 = vsel %vm137_vm4, %v548_v52, 0.0 }
  0xbe   :  { %v1023_v55 = vsel %vm127_vm12, %v498_v53, 0.0  ;;  %v1022_v56 = vsel %vm126_vm13, %v493_v54, 0.0  ;;  %v307_v53 = vld [vmem:[%s2870_s0 + $0x280] sm:$0xff]  ;;  %vm141_vm12 = vcmp.eq.s32.totalorder %v77_v29, %v2009_v8  ;;  %vm146_vm13 = vcmp.eq.s32.totalorder %v78_v44, %v2017_v11 }
  0xbf   :  { %v1129_v57 = vadd.f32 %v1128_v45, %v1023_v55  ;;  %v1221_v58 = vadd.f32 %v1220_v23, %v1022_v56  ;;  %v318_v55 = vld [vmem:[%s2870_s0 + $0x2d8] sm:$0xff]  ;;  %v313_v56 = vld [vmem:[%s2870_s0 + $0x2b0] sm:$0xff] }
  0xc1   :  { %v1130_v0 = vadd.f32 %v1129_v57, %v1027_v61 }
  0xc2   :  { %697 = vperm.xlu2 %1751, %v295_v60   ;;  %v49_v60 = vrot.slane %v1991_v59, 4 }
  0xc3   :  { %752 = vperm.xlu1 %1750, %v306_v62   ;;  %727 = vperm.xlu0 %1749, %v301_v63  }
  0xc4   :  { %v563_v1 = vpop.permute.xlu2 %562 }
  0xc5   :  { %v513_v3 = vpop.permute.xlu1 %512  ;;  %v508_v4 = vpop.permute.xlu0 %507  ;;  %v1036_v40 = vsel %vm140_vm7, %v563_v1, 0.0 }
  0xc6   :  { %v1026_v5 = vsel %vm130_vm15, %v513_v3, 0.0  ;;  %v1025_v6 = vsel %vm129_vm0, %v508_v4, 0.0  ;;  %v322_v3 = vld [vmem:[%s2870_s0 + $0x2f8] sm:$0xff]  ;;  %vm144_vm15 = vcmp.eq.s32.totalorder %v78_v44, %v1991_v59 }
  0xc7   :  { %v1222_v7 = vadd.f32 %v1221_v58, %v1026_v5  ;;  %v1191_v9 = vadd.f32 %v1190_v37, %v1025_v6  ;;  %v317_v5 = vld [vmem:[%s2870_s0 + $0x2d0] sm:$0xff]  ;;  %v312_v6 = vld [vmem:[%s2870_s0 + $0x2a8] sm:$0xff] }
  0xc9   :  { %v1223_v16 = vadd.f32 %v1222_v7, %v1030_v12  ;;  %v79_v7 = vperm.slane %v49_v60, 0  ;;  %v50_v12 = vrot.slane %v1991_v59, 5 }
  0xca   :  { %772 = vperm.xlu2 %1751, %v310_v10  }
  0xcb   :  { %747 = vperm.xlu1 %1750, %v305_v13   ;;  %722 = vperm.xlu0 %1749, %v300_v14   ;;  %vm149_vm0 = vcmp.eq.s32.totalorder %v79_v7, %v2009_v8  ;;  %vm148_vm1 = vcmp.eq.s32.totalorder %v79_v7, %v1991_v59 }
  0xcc   :  { %v578_v17 = vpop.permute.xlu2 %577 }
  0xcd   :  { %v528_v19 = vpop.permute.xlu1 %527  ;;  %v523_v20 = vpop.permute.xlu0 %522  ;;  %v1039_v54 = vsel %vm143_vm10, %v578_v17, 0.0 }
  0xce   :  { %v1029_v21 = vsel %vm133_vm2, %v528_v19, 0.0  ;;  %v1028_v22 = vsel %vm132_vm3, %v523_v20, 0.0  ;;  %v321_v19 = vld [vmem:[%s2870_s0 + $0x2f0] sm:$0xff]  ;;  %vm147_vm2 = vcmp.eq.s32.totalorder %v79_v7, %v1959_v42 }
  0xcf   :  { %v1192_v23 = vadd.f32 %v1191_v9, %v1029_v21  ;;  %v1161_v24 = vadd.f32 %v1160_v51, %v1028_v22  ;;  %v316_v21 = vld [vmem:[%s2870_s0 + $0x2c8] sm:$0xff]  ;;  %v311_v22 = vld [vmem:[%s2870_s0 + $0x2a0] sm:$0xff] }
  0xd1   :  { %v1193_v30 = vadd.f32 %v1192_v23, %v1033_v26  ;;  %v80_v23 = vperm.slane %v50_v12, 0  ;;  %v51_v26 = vrot.slane %v1991_v59, 6  ;;  %v333_v12 = vld [vmem:[%s2870_s0 + $0x350] sm:$0xff] }
  0xd2   :  { %767 = vperm.xlu2 %1751, %v309_v25  }
  0xd3   :  { %742 = vperm.xlu1 %1750, %v304_v27   ;;  %717 = vperm.xlu0 %1749, %v299_v28   ;;  %vm152_vm3 = vcmp.eq.s32.totalorder %v80_v23, %v1991_v59  ;;  %vm151_vm4 = vcmp.eq.s32.totalorder %v80_v23, %v1959_v42  ;;  %vm154_vm7 = vcmp.eq.s32.totalorder %v80_v23, %v2017_v11 }
  0xd4   :  { %v593_v31 = vpop.permute.xlu2 %592 }
  0xd5   :  { %v543_v33 = vpop.permute.xlu1 %542  ;;  %v538_v34 = vpop.permute.xlu0 %537  ;;  %v1042_v4 = vsel %vm146_vm13, %v593_v31, 0.0 }
  0xd6   :  { %v1032_v35 = vsel %vm136_vm5, %v543_v33, 0.0  ;;  %v1031_v36 = vsel %vm135_vm6, %v538_v34, 0.0  ;;  %v320_v33 = vld [vmem:[%s2870_s0 + $0x2e8] sm:$0xff]  ;;  %vm150_vm5 = vcmp.eq.s32.totalorder %v79_v7, %v2017_v11 }
  0xd7   :  { %v1162_v37 = vadd.f32 %v1161_v24, %v1032_v35  ;;  %v1131_v38 = vadd.f32 %v1130_v0, %v1031_v36  ;;  %v315_v35 = vld [vmem:[%s2870_s0 + $0x2c0] sm:$0xff]  ;;  %v326_v36 = vld [vmem:[%s2870_s0 + $0x318] sm:$0xff] }
  0xd9   :  { %v1163_v45 = vadd.f32 %v1162_v37, %v1036_v40  ;;  %v81_v37 = vperm.slane %v51_v26, 0 }
  0xda   :  { %762 = vperm.xlu2 %1751, %v308_v39  }
  0xdb   :  { %737 = vperm.xlu1 %1750, %v303_v41   ;;  %792 = vperm.xlu0 %1749, %v314_v43   ;;  %vm155_vm6 = vcmp.eq.s32.totalorder %v81_v37, %v1959_v42  ;;  %vm157_vm10 = vcmp.eq.s32.totalorder %v81_v37, %v2009_v8 }
  0xdc   :  { %v608_v46 = vpop.permute.xlu2 %607 }
  0xdd   :  { %v558_v47 = vpop.permute.xlu1 %557  ;;  %v553_v48 = vpop.permute.xlu0 %552  ;;  %v1045_v20 = vsel %vm149_vm0, %v608_v46, 0.0 }
  0xde   :  { %v1035_v49 = vsel %vm139_vm8, %v558_v47, 0.0  ;;  %v1034_v50 = vsel %vm138_vm9, %v553_v48, 0.0  ;;  %v319_v47 = vld [vmem:[%s2870_s0 + $0x2e0] sm:$0xff]  ;;  %vm153_vm8 = vcmp.eq.s32.totalorder %v80_v23, %v2009_v8  ;;  %vm158_vm9 = vcmp.eq.s32.totalorder %v81_v37, %v2017_v11 }
  0xdf   :  { %v1132_v51 = vadd.f32 %v1131_v38, %v1035_v49  ;;  %v1224_v52 = vadd.f32 %v1223_v16, %v1034_v50  ;;  %v330_v49 = vld [vmem:[%s2870_s0 + $0x338] sm:$0xff]  ;;  %v325_v50 = vld [vmem:[%s2870_s0 + $0x310] sm:$0xff] }
  0xe1   :  { %v1133_v57 = vadd.f32 %v1132_v51, %v1039_v54 }
  0xe2   :  { %757 = vperm.xlu2 %1751, %v307_v53   ;;  %v52_v53 = vrot.slane %v1991_v59, 7 }
  0xe3   :  { %812 = vperm.xlu1 %1750, %v318_v55   ;;  %787 = vperm.xlu0 %1749, %v313_v56  }
  0xe4   :  { %v623_v58 = vpop.permute.xlu2 %622 }
  0xe5   :  { %v573_v61 = vpop.permute.xlu1 %572  ;;  %v568_v62 = vpop.permute.xlu0 %567  ;;  %v1048_v34 = vsel %vm152_vm3, %v623_v58, 0.0 }
  0xe6   :  { %v1038_v63 = vsel %vm142_vm11, %v573_v61, 0.0  ;;  %v1037_v0 = vsel %vm141_vm12, %v568_v62, 0.0  ;;  %v334_v61 = vld [vmem:[%s2870_s0 + $0x358] sm:$0xff]  ;;  %vm156_vm11 = vcmp.eq.s32.totalorder %v81_v37, %v1991_v59 }
  0xe7   :  { %v1225_v1 = vadd.f32 %v1224_v52, %v1038_v63  ;;  %v1194_v2 = vadd.f32 %v1193_v30, %v1037_v0  ;;  %v329_v63 = vld [vmem:[%s2870_s0 + $0x330] sm:$0xff]  ;;  %v324_v0 = vld [vmem:[%s2870_s0 + $0x308] sm:$0xff] }
  0xe9   :  { %v1226_v9 = vadd.f32 %v1225_v1, %v1042_v4  ;;  %v82_v1 = vperm.slane %v52_v53, 0 }
  0xea   :  { %832 = vperm.xlu2 %1751, %v322_v3  }
  0xeb   :  { %807 = vperm.xlu1 %1750, %v317_v5   ;;  %782 = vperm.xlu0 %1749, %v312_v6   ;;  %vm161_vm12 = vcmp.eq.s32.totalorder %v82_v1, %v2009_v8  ;;  %vm160_vm13 = vcmp.eq.s32.totalorder %v82_v1, %v1991_v59 }
  0xec   :  { %v638_v10 = vpop.permute.xlu2 %637 }
  0xed   :  { %v588_v13 = vpop.permute.xlu1 %587  ;;  %v583_v14 = vpop.permute.xlu0 %582  ;;  %v1051_v48 = vsel %vm155_vm6, %v638_v10, 0.0 }
  0xee   :  { %v1041_v15 = vsel %vm145_vm14, %v588_v13, 0.0  ;;  %v1040_v16 = vsel %vm144_vm15, %v583_v14, 0.0  ;;  %v328_v14 = vld [vmem:[%s2870_s0 + $0x328] sm:$0xff]  ;;  %vm159_vm14 = vcmp.eq.s32.totalorder %v82_v1, %v1959_v42 }
  0xef   :  { %v1195_v17 = vadd.f32 %v1194_v2, %v1041_v15  ;;  %v1164_v18 = vadd.f32 %v1163_v45, %v1040_v16  ;;  %v323_v15 = vld [vmem:[%s2870_s0 + $0x300] sm:$0xff]  ;;  %v83_v16 = vperm.slane %v2009_v8, 0 }
  0xf1   :  { %v1196_v24 = vadd.f32 %v1195_v17, %v1045_v20  ;;  %v53_v17 = vrot.slane %v2009_v8, 1  ;;  %vm164_vm15 = vcmp.eq.s32.totalorder %v83_v16, %v1991_v59 }
  0xf2   :  { %827 = vperm.xlu2 %1751, %v321_v19  }
  0xf3   :  { %802 = vperm.xlu1 %1750, %v316_v21   ;;  %777 = vperm.xlu0 %1749, %v311_v22   ;;  %v2267_v20 = vperm.slane %v53_v17, 0 }
  0xf4   :  { %v653_v25 = vpop.permute.xlu2 %652 }
  0xf5   :  { %v603_v27 = vpop.permute.xlu1 %602  ;;  %v598_v28 = vpop.permute.xlu0 %597  ;;  %v1054_v62 = vsel %vm158_vm9, %v653_v25, 0.0  ;;  %vm168_vm0 = vcmp.eq.s32.totalorder %v2267_v20, %v1991_v59  ;;  %vm167_vm3 = vcmp.eq.s32.totalorder %v2267_v20, %v1959_v42  ;;  %vm170_vm6 = vcmp.eq.s32.totalorder %v2267_v20, %v2017_v11 }
  0xf6   :  { %v1044_v29 = vsel %vm148_vm1, %v603_v27, 0.0  ;;  %v1043_v30 = vsel %vm147_vm2, %v598_v28, 0.0  ;;  %v332_v27 = vld [vmem:[%s2870_s0 + $0x348] sm:$0xff]  ;;  %vm163_vm1 = vcmp.eq.s32.totalorder %v83_v16, %v1959_v42  ;;  %vm162_vm2 = vcmp.eq.s32.totalorder %v82_v1, %v2017_v11 }
  0xf7   :  { %v1165_v31 = vadd.f32 %v1164_v18, %v1044_v29  ;;  %v1134_v32 = vadd.f32 %v1133_v57, %v1043_v30  ;;  %v327_v29 = vld [vmem:[%s2870_s0 + $0x320] sm:$0xff]  ;;  %v338_v30 = vld [vmem:[%s2870_s0 + $0x378] sm:$0xff] }
  0xf9   :  { %v1166_v38 = vadd.f32 %v1165_v31, %v1048_v34 }
  0xfa   :  { %822 = vperm.xlu2 %1751, %v320_v33  }
  0xfb   :  { %797 = vperm.xlu1 %1750, %v315_v35   ;;  %852 = vperm.xlu0 %1749, %v326_v36  }
  0xfc   :  { %v668_v39 = vpop.permute.xlu2 %667 }
  0xfd   :  { %v618_v40 = vpop.permute.xlu1 %617  ;;  %v613_v41 = vpop.permute.xlu0 %612  ;;  %v1057_v13 = vsel %vm161_vm12, %v668_v39, 0.0 }
  0xfe   :  { %v1047_v43 = vsel %vm151_vm4, %v618_v40, 0.0  ;;  %v1046_v44 = vsel %vm150_vm5, %v613_v41, 0.0  ;;  %v331_v41 = vld [vmem:[%s2870_s0 + $0x340] sm:$0xff]  ;;  %vm166_vm4 = vcmp.eq.s32.totalorder %v83_v16, %v2017_v11  ;;  %vm165_vm5 = vcmp.eq.s32.totalorder %v83_v16, %v2009_v8 }
  0xff   :  { %v1135_v45 = vadd.f32 %v1134_v32, %v1047_v43  ;;  %v1227_v46 = vadd.f32 %v1226_v9, %v1046_v44  ;;  %v342_v44 = vld [vmem:[%s2870_s0 + $0x398] sm:$0xff] }
 0x101   :  { %v1136_v51 = vadd.f32 %v1135_v45, %v1051_v48  ;;  %v337_v45 = vld [vmem:[%s2870_s0 + $0x370] sm:$0xff] }
 0x102   :  { %817 = vperm.xlu2 %1751, %v319_v47  }
 0x103   :  { %872 = vperm.xlu1 %1750, %v330_v49   ;;  %847 = vperm.xlu0 %1749, %v325_v50  }
 0x104   :  { %v683_v52 = vpop.permute.xlu2 %682 }
 0x105   :  { %v633_v54 = vpop.permute.xlu1 %632  ;;  %v628_v55 = vpop.permute.xlu0 %627  ;;  %v1060_v28 = vsel %vm164_vm15, %v683_v52, 0.0 }
 0x106   :  { %v1050_v56 = vsel %vm154_vm7, %v633_v54, 0.0  ;;  %v1049_v57 = vsel %vm153_vm8, %v628_v55, 0.0  ;;  %v346_v54 = vld [vmem:[%s2870_s0 + $0x3b8] sm:$0xff]  ;;  %vm169_vm8 = vcmp.eq.s32.totalorder %v2267_v20, %v2009_v8  ;;  %v344_v20 = vld [vmem:[%s2870_s0 + $0x3a8] sm:$0xff] }
 0x107   :  { %v1228_v58 = vadd.f32 %v1227_v46, %v1050_v56  ;;  %v1197_v60 = vadd.f32 %v1196_v24, %v1049_v57  ;;  %v54_v46 = vrot.slane %v2009_v8, 2  ;;  %v341_v57 = vld [vmem:[%s2870_s0 + $0x390] sm:$0xff] }
 0x109   :  { %v1229_v2 = vadd.f32 %v1228_v58, %v1054_v62  ;;  %v2305_v55 = vperm.slane %v54_v46, 0  ;;  %v336_v58 = vld [vmem:[%s2870_s0 + $0x368] sm:$0xff]  ;;  %v347_v46 = vld [vmem:[%s2870_s0 + $0x3c0] sm:$0xff] }
 0x10a   :  { %892 = vperm.xlu2 %1751, %v334_v61   ;;  %v55_v61 = vrot.slane %v2009_v8, 3 }
 0x10b   :  { %867 = vperm.xlu1 %1750, %v329_v63   ;;  %842 = vperm.xlu0 %1749, %v324_v0   ;;  %vm174_vm7 = vcmp.eq.s32.totalorder %v2305_v55, %v2017_v11  ;;  %v56_v63 = vrot.slane %v2009_v8, 4 }
 0x10c   :  { %v2250_v3 = vpop.permute.xlu2 %712 }
 0x10d   :  { %v648_v4 = vpop.permute.xlu1 %647  ;;  %v643_v5 = vpop.permute.xlu0 %642  ;;  %v1066_v56 = vsel %vm170_vm6, %v2250_v3, 0.0 }
 0x10e   :  { %v1053_v6 = vsel %vm157_vm10, %v648_v4, 0.0  ;;  %v1052_v7 = vsel %vm156_vm11, %v643_v5, 0.0  ;;  %vm173_vm10 = vcmp.eq.s32.totalorder %v2305_v55, %v2009_v8 }
 0x10f   :  { %v1198_v9 = vadd.f32 %v1197_v60, %v1053_v6  ;;  %v1167_v10 = vadd.f32 %v1166_v38, %v1052_v7  ;;  %v345_v6 = vld [vmem:[%s2870_s0 + $0x3b0] sm:$0xff]  ;;  %v2323_v7 = vperm.slane %v55_v61, 0 }
 0x111   :  { %v1199_v18 = vadd.f32 %v1198_v9, %v1057_v13  ;;  %v340_v9 = vld [vmem:[%s2870_s0 + $0x388] sm:$0xff]  ;;  %vm178_vm9 = vcmp.eq.s32.totalorder %v2323_v7, %v2017_v11  ;;  %vm177_vm12 = vcmp.eq.s32.totalorder %v2323_v7, %v2009_v8  ;;  %vm176_vm15 = vcmp.eq.s32.totalorder %v2323_v7, %v1991_v59 }
 0x112   :  { %887 = vperm.xlu2 %1751, %v333_v12   ;;  %v2331_v12 = vperm.slane %v56_v63, 0 }
 0x113   :  { %862 = vperm.xlu1 %1750, %v328_v14   ;;  %837 = vperm.xlu0 %1749, %v323_v15  }
 0x114   :  { %v703_v19 = vpop.permute.xlu2 %702  ;;  %vm182_vm11 = vcmp.eq.s32.totalorder %v2331_v12, %v2017_v11 }
 0x115   :  { %v663_v21 = vpop.permute.xlu1 %662  ;;  %v658_v22 = vpop.permute.xlu0 %657  ;;  %v1064_v32 = vsel %vm168_vm0, %v703_v19, 0.0 }
 0x116   :  { %v1056_v23 = vsel %vm160_vm13, %v663_v21, 0.0  ;;  %v1055_v24 = vsel %vm159_vm14, %v658_v22, 0.0  ;;  %v339_v22 = vld [vmem:[%s2870_s0 + $0x380] sm:$0xff]  ;;  %vm172_vm13 = vcmp.eq.s32.totalorder %v2305_v55, %v1991_v59  ;;  %vm181_vm14 = vcmp.eq.s32.totalorder %v2331_v12, %v2009_v8 }
 0x117   :  { %v1168_v25 = vadd.f32 %v1167_v10, %v1056_v23  ;;  %v1137_v26 = vadd.f32 %v1136_v51, %v1055_v24  ;;  %v335_v10 = vld [vmem:[%s2870_s0 + $0x360] sm:$0xff]  ;;  %v350_v23 = vld [vmem:[%s2870_s0 + $0x3d8] sm:$0xff] }
 0x119   :  { %v1169_v31 = vadd.f32 %v1168_v25, %v1060_v28 }
 0x11a   :  { %882 = vperm.xlu2 %1751, %v332_v27  }
 0x11b   :  { %857 = vperm.xlu1 %1750, %v327_v29   ;;  %912 = vperm.xlu0 %1749, %v338_v30   ;;  %v2282_v33 = vadd.f32 %v1169_v31, %v1064_v32  ;;  %v343_v32 = vld [vmem:[%s2870_s0 + $0x3a0] sm:$0xff] }
 0x11c   :  { %v698_v34 = vpop.permute.xlu2 %697 }
 0x11d   :  { %v678_v35 = vpop.permute.xlu1 %677  ;;  %v673_v36 = vpop.permute.xlu0 %672  ;;  %v1063_v43 = vsel %vm167_vm3, %v698_v34, 0.0 }
 0x11e   :  { %v1059_v37 = vsel %vm163_vm1, %v678_v35, 0.0  ;;  %v1058_v38 = vsel %vm162_vm2, %v673_v36, 0.0  ;;  %v354_v35 = vld [vmem:[%s2870_s0 + $0x3f8] sm:$0xff]  ;;  %v349_v36 = vld [vmem:[%s2870_s0 + $0x3d0] sm:$0xff]  ;;  %vm180_vm1 = vcmp.eq.s32.totalorder %v2331_v12, %v1991_v59  ;;  %v348_v59 = vld [vmem:[%s2870_s0 + $0x3c8] sm:$0xff] }
 0x11f   :  { %v1138_v39 = vadd.f32 %v1137_v26, %v1059_v37  ;;  %v1230_v40 = vadd.f32 %v1229_v2, %v1058_v38  ;;  %v57_v38 = vrot.slane %v2009_v8, 5 }
 0x121   :  { %v2295_v42 = vadd.f32 %v1138_v39, %v1063_v43 }
 0x122   :  { %877 = vperm.xlu2 %1751, %v331_v41  }
 0x123   :  { %932 = vperm.xlu1 %1750, %v342_v44   ;;  %907 = vperm.xlu0 %1749, %v337_v45  }
 0x124   :  { %v773_v47 = vpop.permute.xlu2 %772 }
 0x125   :  { %v693_v48 = vpop.permute.xlu1 %692  ;;  %v688_v49 = vpop.permute.xlu0 %687  ;;  %v1078_v21 = vsel %vm182_vm11, %v773_v47, 0.0  ;;  %v2380_v47 = vperm.slane %v57_v38, 0 }
 0x126   :  { %v1062_v50 = vsel %vm166_vm4, %v693_v48, 0.0  ;;  %v1061_v51 = vsel %vm165_vm5, %v688_v49, 0.0 }
 0x127   :  { %v1231_v52 = vadd.f32 %v1230_v40, %v1062_v50  ;;  %v1200_v53 = vadd.f32 %v1199_v18, %v1061_v51  ;;  %v353_v50 = vld [vmem:[%s2870_s0 + $0x3f0] sm:$0xff]  ;;  %vm186_vm3 = vcmp.eq.s32.totalorder %v2380_v47, %v2017_v11 }
 0x129   :  { %v1232_v60 = vadd.f32 %v1231_v52, %v1066_v56  ;;  %v59_v52 = vrot.slane %v2009_v8, 7 }
 0x12a   :  { %952 = vperm.xlu2 %1751, %v346_v54  }
 0x12b   :  { %927 = vperm.xlu1 %1750, %v341_v57   ;;  %902 = vperm.xlu0 %1749, %v336_v58   ;;  %v2407_v63 = vperm.slane %v59_v52, 0 }
 0x12c   :  { %v768_v62 = vpop.permute.xlu2 %767 }
 0x12d   :  { %v733_v0 = vpop.permute.xlu1 %732  ;;  %v708_v1 = vpop.permute.xlu0 %707  ;;  %v1077_v34 = vsel %vm181_vm14, %v768_v62, 0.0  ;;  %v351_v62 = vld [vmem:[%s2870_s0 + $0x3e0] sm:$0xff] }
 0x12e   :  { %v1070_v2 = vsel %vm174_vm7, %v733_v0, 0.0  ;;  %v1065_v3 = vsel %vm169_vm8, %v708_v1, 0.0 }
 0x12f   :  { %v1233_v4 = vadd.f32 %v1232_v60, %v1070_v2  ;;  %v1201_v5 = vadd.f32 %v1200_v53, %v1065_v3  ;;  %v1537_v60 = vld [vmem:[%s2872_s5 + $0x78] sm:$0xff]  ;;  %v2419_v3 = vld [vmem:[%s2871_s1 + $0x10] sm:$0xff] }
 0x130   :  { %v2412_v2 = vld [vmem:[%s2871_s1 + $0x18] sm:$0xff]  ;;  %vm185_vm6 = vcmp.eq.s32.totalorder %v2380_v47, %v2419_v3 }
 0x131   :  { %vm194_vm7 = vcmp.eq.s32.totalorder %v2407_v63, %v2412_v2 }
 0x132   :  { %947 = vperm.xlu2 %1751, %v345_v6  }
 0x133   :  { %922 = vperm.xlu1 %1750, %v340_v9   ;;  %897 = vperm.xlu0 %1749, %v335_v10  }
 0x134   :  { %v763_v13 = vpop.permute.xlu2 %762 }
 0x135   :  { %v753_v14 = vpop.permute.xlu1 %752  ;;  %v728_v15 = vpop.permute.xlu0 %727  ;;  %v1076_v48 = vsel %vm180_vm1, %v763_v13, 0.0 }
 0x136   :  { %v1074_v16 = vsel %vm178_vm9, %v753_v14, 0.0  ;;  %v1069_v17 = vsel %vm173_vm10, %v728_v15, 0.0  ;;  %v1535_v14 = vld [vmem:[%s2872_s5 + $0x68] sm:$0xff]  ;;  %v1536_v15 = vld [vmem:[%s2872_s5 + $0x70] sm:$0xff]  ;;  %vm193_vm10 = vcmp.eq.s32.totalorder %v2407_v63, %v2419_v3 }
 0x137   :  { %v1234_v18 = vadd.f32 %v1233_v4, %v1074_v16  ;;  %v1202_v19 = vadd.f32 %v1201_v5, %v1069_v17  ;;  %v13_v17 = vstv %s2873_s7 }
 0x138   :  { %14 = vst [vmem:[#allocation2] sm:$0x1] %v13_v17  ;;  %v63_v17 = vrot.slane %v2412_v2, 4 }
 0x139   :  { %v1235_v24 = vadd.f32 %v1234_v18, %v1078_v21  ;;  %v2444_v18 = vld [vmem:[%s2871_s1 + $0x8] sm:$0xff] }
 0x13a   :  { %942 = vperm.xlu2 %1751, %v344_v20   ;;  %vm184_vm9 = vcmp.eq.s32.totalorder %v2380_v47, %v2444_v18 }
 0x13b   :  { %917 = vperm.xlu1 %1750, %v339_v22   ;;  %972 = vperm.xlu0 %1749, %v350_v23  }
 0x13c   :  { %v758_v27 = vpop.permute.xlu2 %757 }
 0x13d   :  { %v748_v25 = vpop.permute.xlu1 %747  ;;  %v723_v26 = vpop.permute.xlu0 %722 }
 0x13e   :  { %v1073_v28 = vsel %vm177_vm12, %v748_v25, 0.0  ;;  %v1068_v29 = vsel %vm172_vm13, %v723_v26, 0.0  ;;  %v1531_v26 = vld [vmem:[%s2872_s5 + $0x48] sm:$0xff]  ;;  %vm192_vm13 = vcmp.eq.s32.totalorder %v2407_v63, %v2444_v18 }
 0x13f   :  { %v1203_v30 = vadd.f32 %v1202_v19, %v1073_v28  ;;  %v1171_v31 = vadd.f32 %v2282_v33, %v1068_v29  ;;  %v2369_v33 = vld [vmem:[%s2871_s1] sm:$0xff]  ;;  %v1532_v28 = vld [vmem:[%s2872_s5 + $0x50] sm:$0xff]  ;;  %v1533_v29 = vld [vmem:[%s2872_s5 + $0x58] sm:$0xff] }
 0x140   :  { %vm171_vm0 = vcmp.eq.s32.totalorder %v2305_v55, %v2369_v33  ;;  %vm175_vm2 = vcmp.eq.s32.totalorder %v2323_v7, %v2369_v33  ;;  %vm179_vm4 = vcmp.eq.s32.totalorder %v2331_v12, %v2369_v33  ;;  %v1534_v12 = vld [vmem:[%s2872_s5 + $0x60] sm:$0xff]  ;;  %vm183_vm12 = vcmp.eq.s32.totalorder %v2380_v47, %v2369_v33 }
 0x141   :  { %v1204_v37 = vadd.f32 %v1203_v30, %v1077_v34  ;;  %v1075_v11 = vsel %vm179_vm4, %v758_v27, 0.0 }
 0x142   :  { %937 = vperm.xlu2 %1751, %v343_v32  }
 0x143   :  { %992 = vperm.xlu1 %1750, %v354_v35   ;;  %967 = vperm.xlu0 %1749, %v349_v36  }
 0x144   :  { %v833_v49 = vpop.permute.xlu2 %832 }
 0x145   :  { %v743_v39 = vpop.permute.xlu1 %742  ;;  %v718_v40 = vpop.permute.xlu0 %717  ;;  %v1090_v13 = vsel %vm194_vm7, %v833_v49, 0.0  ;;  %v1525_v49 = vld [vmem:[%s2872_s5 + $0x18] sm:$0xff] }
 0x146   :  { %v1072_v41 = vsel %vm176_vm15, %v743_v39, 0.0  ;;  %v1067_v43 = vsel %vm171_vm0, %v718_v40, 0.0  ;;  %v1528_v39 = vld [vmem:[%s2872_s5 + $0x30] sm:$0xff] }
 0x147   :  { %v1172_v44 = vadd.f32 %v1171_v31, %v1072_v41  ;;  %v1140_v45 = vadd.f32 %v2295_v42, %v1067_v43  ;;  %v58_v42 = vrot.slane %v2009_v8, 6  ;;  %v352_v8 = vld [vmem:[%s2870_s0 + $0x3e8] sm:$0xff]  ;;  %v1529_v41 = vld [vmem:[%s2872_s5 + $0x38] sm:$0xff]  ;;  %v1530_v43 = vld [vmem:[%s2872_s5 + $0x40] sm:$0xff] }
 0x149   :  { %v1173_v51 = vadd.f32 %v1172_v44, %v1076_v48  ;;  %v2399_v61 = vperm.slane %v58_v42, 0 }
 0x14a   :  { %957 = vperm.xlu2 %1751, %v347_v46  }
 0x14b   :  { %987 = vperm.xlu1 %1750, %v353_v50   ;;  %962 = vperm.xlu0 %1749, %v348_v59   ;;  %vm190_vm5 = vcmp.eq.s32.totalorder %v2399_v61, %v2412_v2  ;;  %vm189_vm8 = vcmp.eq.s32.totalorder %v2399_v61, %v2419_v3  ;;  %vm188_vm11 = vcmp.eq.s32.totalorder %v2399_v61, %v2444_v18  ;;  %v1526_v59 = vld [vmem:[%s2872_s5 + $0x20] sm:$0xff] }
 0x14c   :  { %v828_v1 = vpop.permute.xlu2 %827  ;;  %vm187_vm14 = vcmp.eq.s32.totalorder %v2399_v61, %v2369_v33 }
 0x14d   :  { %v738_v53 = vpop.permute.xlu1 %737  ;;  %v793_v54 = vpop.permute.xlu0 %792  ;;  %v1089_v27 = vsel %vm193_vm10, %v828_v1, 0.0 }
 0x14e   :  { %v1071_v55 = vsel %vm175_vm2, %v738_v53, 0.0  ;;  %v1082_v56 = vsel %vm186_vm3, %v793_v54, 0.0  ;;  %v1522_v53 = vld [vmem:[%s2872_s5] sm:$0xff]  ;;  %v1523_v54 = vld [vmem:[%s2872_s5 + $0x8] sm:$0xff] }
 0x14f   :  { %v1141_v57 = vadd.f32 %v1140_v45, %v1071_v55  ;;  %v1236_v58 = vadd.f32 %v1235_v24, %v1082_v56  ;;  %v1524_v55 = vld [vmem:[%s2872_s5 + $0x10] sm:$0xff] }
 0x151   :  { %v1142_v0 = vadd.f32 %v1141_v57, %v1075_v11 }
 0x152   :  { %1615 = vperm.xlu2 %1751, %v1537_v60   ;;  %v1651_v60 = vld [vmem:[#allocation2] sm:$0x1] }
 0x153   :  { %977 = vperm.xlu1 %1750, %v351_v62   ;;  %982 = vperm.xlu0 %1749, %v352_v8  }
 0x154   :  { %v823_v19 = vpop.permute.xlu2 %822 }
 0x155   :  { %v813_v4 = vpop.permute.xlu1 %812  ;;  %v788_v5 = vpop.permute.xlu0 %787  ;;  %v1088_v40 = vsel %vm192_vm13, %v823_v19, 0.0 }
 0x156   :  { %v1086_v6 = vsel %vm190_vm5, %v813_v4, 0.0  ;;  %v1081_v7 = vsel %vm185_vm6, %v788_v5, 0.0  ;;  %vm191_vm6 = vcmp.eq.s32.totalorder %v2407_v63, %v2369_v33 }
 0x157   :  { %v1237_v9 = vadd.f32 %v1236_v58, %v1086_v6  ;;  %v1205_v10 = vadd.f32 %v1204_v37, %v1081_v7  ;;  %v60_v7 = vrot.slane %v2412_v2, 1 }
 0x159   :  { %v2434_v16 = vadd.f32 %v1237_v9, %v1090_v13  ;;  %v2524_v9 = vperm.slane %v2412_v2, 0 }
 0x15a   :  { %1600 = vperm.xlu2 %1751, %v1534_v12  }
 0x15b   :  { %1605 = vperm.xlu1 %1750, %v1535_v14   ;;  %1610 = vperm.xlu0 %1749, %v1536_v15   ;;  %v61_v14 = vrot.slane %v2412_v2, 2  ;;  %vm198_vm15 = vcmp.eq.s32.totalorder %v2524_v9, %v2412_v2  ;;  %v62_v15 = vrot.slane %v2412_v2, 3  ;;  %vm197_vm2 = vcmp.eq.s32.totalorder %v2524_v9, %v2419_v3 }
 0x15c   :  { %v2467_v34 = vpop.permute.xlu2 %817  ;;  %vm195_vm10 = vcmp.eq.s32.totalorder %v2524_v9, %v2369_v33 }
 0x15d   :  { %v808_v20 = vpop.permute.xlu1 %807  ;;  %v783_v21 = vpop.permute.xlu0 %782  ;;  %v2539_v19 = vperm.slane %v61_v14, 0 }
 0x15e   :  { %v1085_v22 = vsel %vm189_vm8, %v808_v20, 0.0  ;;  %v1080_v23 = vsel %vm184_vm9, %v783_v21, 0.0  ;;  %vm196_vm8 = vcmp.eq.s32.totalorder %v2524_v9, %v2444_v18 }
 0x15f   :  { %v1206_v24 = vadd.f32 %v1205_v10, %v1085_v22  ;;  %v1174_v25 = vadd.f32 %v1173_v51, %v1080_v23  ;;  %v1527_v51 = vld [vmem:[%s2872_s5 + $0x28] sm:$0xff]  ;;  %v2526_v10 = vperm.slane %v60_v7, 0  ;;  %v2543_v22 = vperm.slane %v62_v15, 0 }
 0x160   :  { %vm206_vm1 = vcmp.eq.s32.totalorder %v2539_v19, %v2412_v2  ;;  %vm205_vm7 = vcmp.eq.s32.totalorder %v2539_v19, %v2419_v3 }
 0x161   :  { %v2459_v30 = vadd.f32 %v1206_v24, %v1089_v27  ;;  %vm202_vm0 = vcmp.eq.s32.totalorder %v2526_v10, %v2412_v2  ;;  %v64_v24 = vrot.slane %v2412_v2, 5  ;;  %vm210_vm3 = vcmp.eq.s32.totalorder %v2543_v22, %v2412_v2 }
 0x162   :  { %1585 = vperm.xlu2 %1751, %v1531_v26   ;;  %v2547_v26 = vperm.slane %v63_v17, 0  ;;  %vm201_vm4 = vcmp.eq.s32.totalorder %v2526_v10, %v2419_v3  ;;  %vm199_vm13 = vcmp.eq.s32.totalorder %v2526_v10, %v2369_v33 }
 0x163   :  { %1590 = vperm.xlu1 %1750, %v1532_v28   ;;  %1595 = vperm.xlu0 %1749, %v1533_v29   ;;  %v38_v29 = vld [vmem:[%s2874_s2 + $0x18] sm:$0xff] }
 0x164   :  { %v2487_v50 = vpop.permute.xlu2 %892  ;;  %1469 = vmatpush.msra.mxu1 %v38_v29  ;;  %1743 = vmatpush.msra.mxu2 %v38_v29  ;;  %vm214_vm5 = vcmp.eq.s32.totalorder %v2547_v26, %v2412_v2 }
 0x165   :  { %v803_v31 = vpop.permute.xlu1 %802  ;;  %v778_v32 = vpop.permute.xlu0 %777 }
 0x166   :  { %v1084_v35 = vsel %vm188_vm11, %v803_v31, 0.0  ;;  %v1079_v36 = vsel %vm183_vm12, %v778_v32, 0.0  ;;  %v37_v32 = vld [vmem:[%s2874_s2 + $0x10] sm:$0xff]  ;;  %vm1295_vm11 = vcmask 261120   ;;  %vm200_vm12 = vcmp.eq.s32.totalorder %v2526_v10, %v2444_v18 }
 0x167   :  { %v1175_v37 = vadd.f32 %v1174_v25, %v1084_v35  ;;  %v1143_v38 = vadd.f32 %v1142_v0, %v1079_v36  ;;  %v65_v35 = vrot.slane %v2412_v2, 6  ;;  %1470 = vmatpush.msra.mxu1 %v37_v32  ;;  %1744 = vmatpush.msra.mxu2 %v37_v32  ;;  %v1102_v36 = vsel %vm206_vm1, %v2487_v50, 0.0 }
 0x169   :  { %v2478_v44 = vadd.f32 %v1175_v37, %v1088_v40 }
 0x16a   :  { %1570 = vperm.xlu2 %1751, %v1528_v39   ;;  %v36_v39 = vld [vmem:[%s2874_s2 + $0x8] sm:$0xff] }
 0x16b   :  { %1575 = vperm.xlu1 %1750, %v1529_v41   ;;  %1580 = vperm.xlu0 %1749, %v1530_v43   ;;  %v66_v41 = vrot.slane %v2412_v2, 7  ;;  %v35_v43 = vld [vmem:[%s2874_s2] sm:$0xff] }
 0x16c   :  { %v2504_v56 = vpop.permute.xlu2 %887  ;;  %1471 = vmatpush.msra.mxu1 %v36_v39  ;;  %1745 = vmatpush.msra.mxu2 %v36_v39  ;;  %v1793_v39 = vmov 1.0  }
 0x16d   :  { %v798_v45 = vpop.permute.xlu1 %797  ;;  %v853_v46 = vpop.permute.xlu0 %852 }
 0x16e   :  { %v1083_v47 = vsel %vm187_vm14, %v798_v45, 0.0  ;;  %v1094_v20 = vsel %vm198_vm15, %v853_v46, 0.0  ;;  %1472 = vmatpush.msra.mxu1 %v35_v43  ;;  %1746 = vmatpush.msra.mxu2 %v35_v43  ;;  %vm209_vm14 = vcmp.eq.s32.totalorder %v2543_v22, %v2419_v3 }
 0x16f   :  { %v2482_v48 = vadd.f32 %v1143_v38, %v1083_v47  ;;  %v1239_v25 = vadd.f32 %v2434_v16, %v1094_v20  ;;  %v2562_v16 = vperm.slane %v64_v24, 0 }
 0x171   :  { %vm218_vm9 = vcmp.eq.s32.totalorder %v2562_v16, %v2412_v2 }
 0x172   :  { %1555 = vperm.xlu2 %1751, %v1525_v49  }
 0x173   :  { %1560 = vperm.xlu1 %1750, %v1526_v59   ;;  %1565 = vperm.xlu0 %1749, %v1527_v51   ;;  %v2599_v59 = vperm.slane %v65_v35, 0 }
 0x174   :  { %v2508_v61 = vpop.permute.xlu2 %882 }
 0x175   :  { %v873_v42 = vpop.permute.xlu1 %872  ;;  %v848_v52 = vpop.permute.xlu0 %847  ;;  %vm222_vm15 = vcmp.eq.s32.totalorder %v2599_v59, %v2412_v2 }
 0x176   :  { %v1098_v23 = vsel %vm202_vm0, %v873_v42, 0.0  ;;  %v1093_v37 = vsel %vm197_vm2, %v848_v52, 0.0  ;;  %vm213_vm0 = vcmp.eq.s32.totalorder %v2547_v26, %v2419_v3  ;;  %vm204_vm2 = vcmp.eq.s32.totalorder %v2539_v19, %v2444_v18 }
 0x177   :  { %v1240_v31 = vadd.f32 %v1239_v25, %v1098_v23  ;;  %v1208_v49 = vadd.f32 %v2459_v30, %v1093_v37  ;;  %v1263_v30 = vld [vmem:[%s2875_s3] sm:$0xff]  ;;  %v1273_v23 = vld [vmem:[%s2875_s3 + $0x50] sm:$0xff] }
 0x178   :  { %1722 = vmatmul.msk.f32.vlgmr.msra.gmra.mxu1 %vm1295_vm11, %v1263_v30 }
 0x179   :  { %v1241_v40 = vadd.f32 %v1240_v31, %v1102_v36  ;;  %v1100_v31 = vsel %vm204_vm2, %v2508_v61, 0.0  ;;  %vm1249_vm2 = vcmp.ne.s32.totalorder %v2419_v3, 0 }
 0x17a   :  { %1540 = vperm.xlu2 %1751, %v1522_v53   ;;  %v1272_v53 = vld [vmem:[%s2875_s3 + $0x48] sm:$0xff] }
 0x17b   :  { %1545 = vperm.xlu1 %1750, %v1523_v54   ;;  %1550 = vperm.xlu0 %1749, %v1524_v55  }
 0x17c   :  { %v2516_v1 = vpop.permute.xlu2 %877  ;;  %1731 = vmatmul.msk.f32.vlgmr.msra.gmra.mxu2 %vm1295_vm11, %v1272_v53 }
 0x17d   :  { %v868_v57 = vpop.permute.xlu1 %867  ;;  %v2506_v58 = vpop.permute.xlu0 %842 }
 0x17e   :  { %v1097_v45 = vsel %vm201_vm4, %v868_v57, 0.0  ;;  %v1092_v52 = vsel %vm196_vm8, %v2506_v58, 0.0  ;;  %v2621_v57 = vperm.slane %v66_v41, 0  ;;  %v1087_v58 = vsel %vm191_vm6, %v2467_v34, 0.0 }
 0x17f   :  { %v1209_v54 = vadd.f32 %v1208_v49, %v1097_v45  ;;  %v1145_v63 = vadd.f32 %v2482_v48, %v1087_v58  ;;  %vm207_vm4 = vcmp.eq.s32.totalorder %v2543_v22, %v2369_v33  ;;  %vm208_vm6 = vcmp.eq.s32.totalorder %v2543_v22, %v2444_v18  ;;  %v1265_v45 = vld [vmem:[%s2875_s3 + $0x10] sm:$0xff] }
 0x180   :  { %vm226_vm1 = vcmp.eq.s32.totalorder %v2621_v57, %v2412_v2  ;;  %vm221_vm8 = vcmp.eq.s32.totalorder %v2599_v59, %v2419_v3 }
 0x183   :  { %1654 = vperm.xlu0 %1749, %v1651_v60   ;;  %v1101_v60 = vsel %vm205_vm7, %v2504_v56, 0.0  ;;  %vm211_vm7 = vcmp.eq.s32.totalorder %v2547_v26, %v2369_v33 }
 0x184   :  { %v2520_v6 = vpop.permute.xlu2 %952  ;;  %1732 = vmatmul.msk.f32.gmra.mxu2 %vm1295_vm11, %v1273_v23  ;;  %v1285_v23 = vld [vmem:[%s2876_s4 + $0x30] sm:$0xff] }
 0x185   :  { %v2510_v11 = vpop.permute.xlu1 %862  ;;  %v2512_v62 = vpop.permute.xlu0 %837  ;;  %v1114_v7 = vsel %vm218_vm9, %v2520_v6, 0.0  ;;  %v1210_v6 = vadd.f32 %v1209_v54, %v1101_v60  ;;  %vm1250_vm9 = vcmp.ne.s32.totalorder %v2412_v2, 0 }
 0x186   :  { %v1096_v34 = vsel %vm200_vm12, %v2510_v11, 0.0 }
 0x18c   :  { %v2541_v21 = vpop.permute.xlu2 %947 }
 0x18d   :  { %v2514_v8 = vpop.permute.xlu1 %857  ;;  %v913_v0 = vpop.permute.xlu0 %912 }
 0x18e   :  { %v1106_v38 = vsel %vm210_vm3, %v913_v0, 0.0  ;;  %v1091_v0 = vsel %vm195_vm10, %v2512_v62, 0.0  ;;  %vm203_vm3 = vcmp.eq.s32.totalorder %v2539_v19, %v2369_v33  ;;  %vm212_vm10 = vcmp.eq.s32.totalorder %v2547_v26, %v2444_v18 }
 0x18f   :  { %v1242_v50 = vadd.f32 %v1241_v40, %v1106_v38  ;;  %v1146_v48 = vadd.f32 %v1145_v63, %v1091_v0  ;;  %v1099_v32 = vsel %vm203_vm3, %v2516_v1, 0.0  ;;  %vm219_vm3 = vcmp.eq.s32.totalorder %v2599_v59, %v2369_v33  ;;  %v1275_v0 = vld [vmem:[%s2875_s3 + $0x60] sm:$0xff]  ;;  %v1288_v63 = vld [vmem:[%s2876_s4 + $0x48] sm:$0xff] }
 0x194   :  { %v2593_v46 = vpop.permute.xlu2 %942 }
 0x195   :  { %v933_v4 = vpop.permute.xlu1 %932  ;;  %v2518_v5 = vpop.permute.xlu0 %907 }
 0x196   :  { %v1110_v47 = vsel %vm214_vm5, %v933_v4, 0.0  ;;  %v1177_v4 = vadd.f32 %v2478_v44, %v1092_v52  ;;  %v1095_v44 = vsel %vm199_vm13, %v2514_v8, 0.0  ;;  %v1105_v56 = vsel %vm209_vm14, %v2518_v5, 0.0 }
 0x197   :  { %v1243_v55 = vadd.f32 %v1242_v50, %v1110_v47  ;;  %v1147_v5 = vadd.f32 %v1146_v48, %v1095_v44  ;;  %v1211_v10 = vadd.f32 %v1210_v6, %v1105_v56  ;;  %vm217_vm5 = vcmp.eq.s32.totalorder %v2562_v16, %v2419_v3  ;;  %v1289_v44 = vld [vmem:[%s2876_s4 + $0x50] sm:$0xff]  ;;  %v1268_v56 = vld [vmem:[%s2875_s3 + $0x28] sm:$0xff]  ;;  %v1290_v6 = vld [vmem:[%s2876_s4 + $0x58] sm:$0xff] }
 0x198   :  { %v1178_v8 = vadd.f32 %v1177_v4, %v1096_v34  ;;  %v1113_v61 = vsel %vm217_vm5, %v2541_v21, 0.0  ;;  %vm225_vm14 = vcmp.eq.s32.totalorder %v2621_v57, %v2419_v3  ;;  %v1280_v34 = vld [vmem:[%s2876_s4 + $0x8] sm:$0xff]  ;;  %v1281_v48 = vld [vmem:[%s2876_s4 + $0x10] sm:$0xff] }
 0x199   :  { %v1244_v9 = vadd.f32 %v1243_v55, %v1114_v7  ;;  %v1148_v36 = vadd.f32 %v1147_v5, %v1099_v32  ;;  %v1291_v5 = vld [vmem:[%s2876_s4 + $0x60] sm:$0xff] }
 0x19a   :  { %v1179_v2 = vadd.f32 %v1178_v8, %v1100_v31  ;;  %v1282_v8 = vld [vmem:[%s2876_s4 + $0x18] sm:$0xff] }
 0x19c   :  { %v938_v24 = vpop.permute.xlu2 %937 }
 0x19d   :  { %v2528_v12 = vpop.permute.xlu1 %927  ;;  %v2530_v13 = vpop.permute.xlu0 %902 }
 0x19e   :  { %v1109_v11 = vsel %vm213_vm0, %v2528_v12, 0.0  ;;  %v1264_v12 = vld [vmem:[%s2875_s3 + $0x8] sm:$0xff]  ;;  %v1104_v1 = vsel %vm208_vm6, %v2530_v13, 0.0  ;;  %vm216_vm0 = vcmp.eq.s32.totalorder %v2562_v16, %v2444_v18  ;;  %vm223_vm6 = vcmp.eq.s32.totalorder %v2621_v57, %v2369_v33 }
 0x19f   :  { %v1212_v25 = vadd.f32 %v1211_v10, %v1109_v11  ;;  %1723 = vmatmul.msk.f32.gmra.mxu1 %vm1295_vm11, %v1264_v12  ;;  %v1180_v13 = vadd.f32 %v1179_v2, %v1104_v1  ;;  %v1112_v52 = vsel %vm216_vm0, %v2593_v46, 0.0  ;;  %v1266_v46 = vld [vmem:[%s2875_s3 + $0x18] sm:$0xff]  ;;  %v1293_v12 = vld [vmem:[%s2876_s4 + $0x70] sm:$0xff] }
 0x1a0   :  { %v1278_v11 = vld [vmem:[%s2875_s3 + $0x78] sm:$0xff] }
 0x1a1   :  { %v1213_v38 = vadd.f32 %v1212_v25, %v1113_v61  ;;  %v1270_v10 = vld [vmem:[%s2875_s3 + $0x38] sm:$0xff] }
 0x1a2   :  { %v1286_v25 = vld [vmem:[%s2876_s4 + $0x38] sm:$0xff] }
 0x1a5   :  { %v2549_v27 = vpop.permute.xlu1 %922  ;;  %v2551_v28 = vpop.permute.xlu0 %897 }
 0x1a6   :  { %v1103_v35 = vsel %vm207_vm4, %v2551_v28, 0.0  ;;  %v1108_v21 = vsel %vm212_vm10, %v2549_v27, 0.0  ;;  %v1274_v27 = vld [vmem:[%s2875_s3 + $0x58] sm:$0xff] }
 0x1a7   :  { %v1149_v37 = vadd.f32 %v1148_v36, %v1103_v35  ;;  %v1181_v47 = vadd.f32 %v1180_v13, %v1108_v21  ;;  %1724 = vmatmul.msk.f32.gmra.mxu1 %vm1295_vm11, %v1265_v45  ;;  %1733 = vmatmul.msk.f32.gmra.mxu2 %vm1295_vm11, %v1274_v27 }
 0x1a9   :  { %v1182_v53 = vadd.f32 %v1181_v47, %v1112_v52 }
 0x1ad   :  { %v2601_v51 = vpop.permute.xlu1 %917  ;;  %v973_v42 = vpop.permute.xlu0 %972 }
 0x1ae   :  { %v1118_v62 = vsel %vm222_vm15, %v973_v42, 0.0  ;;  %v1107_v19 = vsel %vm211_vm7, %v2601_v51, 0.0  ;;  %vm215_vm15 = vcmp.eq.s32.totalorder %v2562_v16, %v2369_v33  ;;  %v958_v51 = vpop.permute.xlu2 %957  ;;  %vm224_vm7 = vcmp.eq.s32.totalorder %v2621_v57, %v2444_v18  ;;  %v1279_v57 = vld [vmem:[%s2876_s4] sm:$0xff] }
 0x1af   :  { %v1245_v14 = vadd.f32 %v1244_v9, %v1118_v62  ;;  %v1150_v22 = vadd.f32 %v1149_v37, %v1107_v19  ;;  %v1111_v50 = vsel %vm215_vm15, %v938_v24, 0.0  ;;  %v1115_v3 = vsel %vm219_vm3, %v958_v51, 0.0  ;;  %1725 = vmatmul.msk.f32.gmra.mxu1 %vm1295_vm11, %v1266_v46  ;;  %1734 = vmatmul.msk.f32.gmra.mxu2 %vm1295_vm11, %v1275_v0  ;;  %v1277_v62 = vld [vmem:[%s2875_s3 + $0x70] sm:$0xff]  ;;  %v1294_v24 = vld [vmem:[%s2876_s4 + $0x78] sm:$0xff] }
 0x1b0   :  { %v1269_v9 = vld [vmem:[%s2875_s3 + $0x30] sm:$0xff] }
 0x1b1   :  { %v1151_v42 = vadd.f32 %v1150_v22, %v1111_v50 }
 0x1b5   :  { %v993_v15 = vpop.permute.xlu1 %992  ;;  %v968_v17 = vpop.permute.xlu0 %967 }
 0x1b6   :  { %v1122_v20 = vsel %vm226_vm1, %v993_v15, 0.0  ;;  %v1117_v28 = vsel %vm221_vm8, %v968_v17, 0.0  ;;  %vm220_vm1 = vcmp.eq.s32.totalorder %v2599_v59, %v2444_v18  ;;  %v1152_v59 = vadd.f32 %v1151_v42, %v1115_v3  ;;  %v1292_v15 = vld [vmem:[%s2876_s4 + $0x68] sm:$0xff]  ;;  %v1271_v17 = vld [vmem:[%s2875_s3 + $0x40] sm:$0xff] }
 0x1b7   :  { %v1246_v29 = vadd.f32 %v1245_v14, %v1122_v20  ;;  %v1214_v40 = vadd.f32 %v1213_v38, %v1117_v28  ;;  %vm1248_vm8 = vcmp.ne.s32.totalorder %v2444_v18, 0  ;;  %v1276_v18 = vld [vmem:[%s2875_s3 + $0x68] sm:$0xff]  ;;  %v1283_v14 = vld [vmem:[%s2876_s4 + $0x20] sm:$0xff] }
 0x1b8   :  { %1735 = vmatmul.msk.f32.gmra.mxu2 %vm1295_vm11, %v1276_v18  ;;  %v1284_v20 = vld [vmem:[%s2876_s4 + $0x28] sm:$0xff] }
 0x1b9   :  { %vm1254_vm12 = vcmp.eq.f32.partialorder %v1246_v29, 0.0  ;;  %v1287_v29 = vld [vmem:[%s2876_s4 + $0x40] sm:$0xff] }
 0x1ba   :  { %vm1258_vm13 = vmand %vm1250_vm9, %vm1254_vm12  ;;  %vm1247_vm12 = vcmp.ne.s32.totalorder %v2369_v33, 0  ;;  %v1267_v33 = vld [vmem:[%s2875_s3 + $0x20] sm:$0xff] }
 0x1bb   :  { %1702 = vmatpush.msk.msra.mxu0 %vm1258_vm13, %v1793_v39  ;;  %1739 = vmatpush.msk.msra.mxu3 %vm1258_vm13, %v1793_v39 }
 0x1bc   :  { %1726 = vmatmul.msk.f32.gmra.mxu1 %vm1295_vm11, %v1267_v33 }
 0x1bd   :  { %v988_v26 = vpop.permute.xlu1 %987  ;;  %v963_v41 = vpop.permute.xlu0 %962 }
 0x1be   :  { %v1121_v43 = vsel %vm225_vm14, %v988_v26, 0.0  ;;  %v1116_v30 = vsel %vm220_vm1, %v963_v41, 0.0 }
 0x1bf   :  { %v1215_v49 = vadd.f32 %v1214_v40, %v1121_v43  ;;  %v1183_v16 = vadd.f32 %v1182_v53, %v1116_v30 }
 0x1c0   :  { %1736 = vmatmul.msk.f32.gmra.mxu2 %vm1295_vm11, %v1277_v62 }
 0x1c1   :  { %vm1253_vm4 = vcmp.eq.f32.partialorder %v1215_v49, 0.0  ;;  %v1616_v49 = vpop.permute.xlu2 %1615 }
 0x1c2   :  { %vm1257_vm5 = vmand %vm1249_vm2, %vm1253_vm4 }
 0x1c3   :  { %1703 = vmatpush.msk.msra.mxu0 %vm1257_vm5, %v1793_v39  ;;  %1740 = vmatpush.msk.msra.mxu3 %vm1257_vm5, %v1793_v39 }
 0x1c4   :  { %1727 = vmatmul.msk.f32.gmra.mxu1 %vm1295_vm11, %v1268_v56 }
 0x1c5   :  { %v978_v54 = vpop.permute.xlu1 %977  ;;  %v983_v55 = vpop.permute.xlu0 %982 }
 0x1c6   :  { %v1119_v58 = vsel %vm223_vm6, %v978_v54, 0.0  ;;  %v1120_v60 = vsel %vm224_vm7, %v983_v55, 0.0 }
 0x1c7   :  { %v1153_v4 = vadd.f32 %v1152_v59, %v1119_v58  ;;  %v1184_v7 = vadd.f32 %v1183_v16, %v1120_v60 }
 0x1c8   :  { %1737 = vmatmul.msk.f32.gmra.mxu2 %vm1295_vm11, %v1278_v11 }
 0x1c9   :  { %vm1251_vm9 = vcmp.eq.f32.partialorder %v1153_v4, 0.0  ;;  %vm1252_vm10 = vcmp.eq.f32.partialorder %v1184_v7, 0.0  ;;  %v1601_v3 = vpop.permute.xlu2 %1600 }
 0x1ca   :  { %vm1256_vm13 = vmand %vm1248_vm8, %vm1252_vm10 }
 0x1cb   :  { %1704 = vmatpush.msk.msra.mxu0 %vm1256_vm13, %v1793_v39  ;;  %1741 = vmatpush.msk.msra.mxu3 %vm1256_vm13, %v1793_v39  ;;  %vm1255_vm14 = vmand %vm1247_vm12, %vm1251_vm9 }
 0x1cc   :  { %1728 = vmatmul.msk.f32.gmra.mxu1 %vm1295_vm11, %v1269_v9 }
 0x1cd   :  { %1705 = vmatpush.msk.msra.mxu0 %vm1255_vm14, %v1793_v39  ;;  %1742 = vmatpush.msk.msra.mxu3 %vm1255_vm14, %v1793_v39  ;;  %v1611_v51 = vpop.permute.xlu0 %1610  ;;  %v1606_v52 = vpop.permute.xlu1 %1605 }
 0x1ce   :  { %1706 = vmatmul.msk.f32.vlgmr.msra.gmra.mxu0 %vm1295_vm11, %v1279_v57  ;;  %1715 = vmatmul.msk.f32.vlgmr.msra.gmra.mxu3 %vm1295_vm11, %v1288_v63 }
 0x1d1   :  { %v1586_v0 = vpop.permute.xlu2 %1585 }
 0x1d4   :  { %1729 = vmatmul.msk.f32.gmra.mxu1 %vm1295_vm11, %v1270_v10 }
 0x1d5   :  { %v1596_v59 = vpop.permute.xlu0 %1595  ;;  %v1591_v55 = vpop.permute.xlu1 %1590 }
 0x1d6   :  { %1707 = vmatmul.msk.f32.gmra.mxu0 %vm1295_vm11, %v1280_v34  ;;  %1716 = vmatmul.msk.f32.gmra.mxu3 %vm1295_vm11, %v1289_v44 }
 0x1d9   :  { %v1571_v10 = vpop.permute.xlu2 %1570 }
 0x1dc   :  { %1730 = vmatmul.msk.f32.gmra.mxu1 %vm1295_vm11, %v1271_v17 }
 0x1dd   :  { %v1581_v62 = vpop.permute.xlu0 %1580  ;;  %v1576_v9 = vpop.permute.xlu1 %1575 }
 0x1de   :  { %1708 = vmatmul.msk.f32.gmra.mxu0 %vm1295_vm11, %v1281_v48  ;;  %1717 = vmatmul.msk.f32.gmra.mxu3 %vm1295_vm11, %v1290_v6 }
 0x1e6   :  { %1709 = vmatmul.msk.f32.gmra.mxu0 %vm1295_vm11, %v1282_v8  ;;  %1718 = vmatmul.msk.f32.gmra.mxu3 %vm1295_vm11, %v1291_v5 }
 0x1ee   :  { %1710 = vmatmul.msk.f32.gmra.mxu0 %vm1295_vm11, %v1283_v14  ;;  %1719 = vmatmul.msk.f32.gmra.mxu3 %vm1295_vm11, %v1292_v15 }
 0x1f5   :  { %v1474_v31 = vpop.f32.mrf.mxu1 }
 0x1f6   :  { %1711 = vmatmul.msk.f32.gmra.mxu0 %vm1295_vm11, %v1284_v20  ;;  %1720 = vmatmul.msk.f32.gmra.mxu3 %vm1295_vm11, %v1293_v12 }
 0x1fe   :  { %1712 = vmatmul.msk.f32.gmra.mxu0 %vm1295_vm11, %v1285_v23  ;;  %1721 = vmatmul.msk.f32.gmra.mxu3 %vm1295_vm11, %v1294_v24 }
 0x1ff   :  { %v1501_v32 = vpop.f32.mrf.mxu2 }
 0x206   :  { %1713 = vmatmul.msk.f32.gmra.mxu0 %vm1295_vm11, %v1286_v25 }
 0x207   :  { %v1504_v61 = vpop.f32.mrf.mxu2 }
 0x20e   :  { %1714 = vmatmul.msk.f32.gmra.mxu0 %vm1295_vm11, %v1287_v29 }
 0x21c   :  { %v1477_v35 = vpop.f32.mrf.mxu1 }
 0x224   :  { %v2845_v1 = vpop.f32.mrf.mxu1 }
 0x22a   :  { %v1507_v38 = vpop.f32.mrf.mxu2 }
 0x22c   :  { %v2849_v39 = vpop.f32.mrf.mxu1 }
 0x232   :  { %v1510_v22 = vpop.f32.mrf.mxu2 }
 0x239   :  { %v2853_v26 = vpop.f32.mrf.mxu1 }
 0x23b   :  { %v1513_v45 = vpop.f32.mrf.mxu2 }
 0x241   :  { %v1489_v47 = vpop.f32.mrf.mxu1 }
 0x243   :  { %v1516_v30 = vpop.f32.mrf.mxu2 }
 0x249   :  { %v1492_v53 = vpop.f32.mrf.mxu1 }
 0x24b   :  { %v1361_v2 = vpop.f32.mrf.mxu0  ;;  %v1519_v58 = vpop.f32.mrf.mxu2 }
 0x24c   :  { %v2843_v36 = vadd.f32 %v1474_v31, %v1361_v2 }
 0x251   :  { %v1388_v19 = vpop.f32.mrf.mxu3  ;;  %v1495_v60 = vpop.f32.mrf.mxu1 }
 0x252   :  { %v1502_v8 = vadd.f32 %v1501_v32, %v1388_v19  ;;  %v1561_v19 = vpop.permute.xlu1 %1560 }
 0x253   :  { %v1364_v28 = vpop.f32.mrf.mxu0 }
 0x254   :  { %v2847_v37 = vadd.f32 %v1477_v35, %v1364_v28  ;;  %v1627_v23 = vadd.f32 %v1586_v0, %v1502_v8  ;;  %v1566_v35 = vpop.permute.xlu0 %1565 }
 0x259   :  { %v1391_v21 = vpop.f32.mrf.mxu3  ;;  %v1498_v11 = vpop.f32.mrf.mxu1 }
 0x25a   :  { %v1505_v48 = vadd.f32 %v1504_v61, %v1391_v21 }
 0x25b   :  { %v2851_v13 = vpop.f32.mrf.mxu0 }
 0x25c   :  { %v1628_v17 = vadd.f32 %v1591_v55, %v1505_v48 }
 0x261   :  { %v1394_v40 = vpop.f32.mrf.mxu3 }
 0x262   :  { %v1508_v44 = vadd.f32 %v1507_v38, %v1394_v40 }
 0x263   :  { %v2855_v41 = vpop.f32.mrf.mxu0 }
 0x264   :  { %v1629_v5 = vadd.f32 %v1596_v59, %v1508_v44 }
 0x269   :  { %v1397_v43 = vpop.f32.mrf.mxu3 }
 0x26a   :  { %v1511_v33 = vadd.f32 %v1510_v22, %v1397_v43  ;;  %v1556_v22 = vpop.permute.xlu2 %1555  ;;  %v1484_v43 = vadd.f32 %v2849_v39, %v2855_v41 }
 0x26b   :  { %v1373_v27 = vpop.f32.mrf.mxu0 }
 0x26c   :  { %v1630_v6 = vadd.f32 %v1601_v3, %v1511_v33  ;;  %v1487_v38 = vadd.f32 %v2853_v26, %v1373_v27  ;;  %v1621_v26 = vadd.f32 %v1556_v22, %v1484_v43  ;;  %v1551_v27 = vpop.permute.xlu0 %1550 }
 0x271   :  { %v1400_v50 = vpop.f32.mrf.mxu3 }
 0x272   :  { %v1514_v7 = vadd.f32 %v1513_v45, %v1400_v50  ;;  %v1622_v50 = vadd.f32 %v1561_v19, %v1487_v38 }
 0x273   :  { %v1376_v42 = vpop.f32.mrf.mxu0 }
 0x274   :  { %v1631_v56 = vadd.f32 %v1606_v52, %v1514_v7  ;;  %v1490_v2 = vadd.f32 %v1489_v47, %v1376_v42  ;;  %v1481_v47 = vadd.f32 %v2845_v1, %v2851_v13 }
 0x276   :  { %v1623_v45 = vadd.f32 %v1566_v35, %v1490_v2  ;;  %v1620_v52 = vadd.f32 %v1551_v27, %v1481_v47 }
 0x279   :  { %v1403_v16 = vpop.f32.mrf.mxu3 }
 0x27a   :  { %v1517_v46 = vadd.f32 %v1516_v30, %v1403_v16  ;;  %v1546_v30 = vpop.permute.xlu1 %1545 }
 0x27b   :  { %v1379_v54 = vpop.f32.mrf.mxu0  ;;  %v1619_v41 = vadd.f32 %v1546_v30, %v2847_v37  ;;  %v1650_v37 = vld [vmem:[%s2877_s6] sm:$0x1] }
 0x27c   :  { %v1632_v18 = vadd.f32 %v1611_v51, %v1517_v46  ;;  %v1493_v29 = vadd.f32 %v1492_v53, %v1379_v54  ;;  %v1541_v53 = vpop.permute.xlu2 %1540 }
 0x27d   :  { %v1618_v13 = vadd.f32 %v1541_v53, %v2843_v36  ;;  %v1655_v36 = vpop.permute.xlu0 %1654 }
 0x27e   :  { %v1624_v21 = vadd.f32 %v1571_v10, %v1493_v29 }
 0x281   :  { %v1406_v4 = vpop.f32.mrf.mxu3 }
 0x282   :  { %v1520_v57 = vadd.f32 %v1519_v58, %v1406_v4  ;;  %v1657_v58 = vperm.slane %v1655_v36, 0 }
 0x283   :  { %v1382_v63 = vpop.f32.mrf.mxu0 }
 0x284   :  { %v1633_v34 = vadd.f32 %v1616_v49, %v1520_v57  ;;  %v1496_v24 = vadd.f32 %v1495_v60, %v1382_v63 }
 0x286   :  { %1752 = vtanh.f32 %v1633_v34  ;;  %v1625_v61 = vadd.f32 %v1576_v9, %v1496_v24 }
 0x287   :  { %1754 = vtanh.f32 %v1632_v18 }
 0x288   :  { %1756 = vtanh.f32 %v1631_v56 }
 0x289   :  { %1758 = vtanh.f32 %v1630_v6 }
 0x28a   :  { %1760 = vtanh.f32 %v1629_v5 }
 0x28b   :  { %v1385_v14 = vpop.f32.mrf.mxu0  ;;  %1762 = vtanh.f32 %v1628_v17 }
 0x28c   :  { %v1753_v15 = vpop.eup %1752  ;;  %v1499_v20 = vadd.f32 %v1498_v11, %v1385_v14  ;;  %1764 = vtanh.f32 %v1627_v23 }
 0x28d   :  { %1658 = vmatpush.msrb.mxu2 %v1753_v15  ;;  %v1755_v12 = vpop.eup %1754 }
 0x28e   :  { %v1757_v25 = vpop.eup %1756  ;;  %v1626_v31 = vadd.f32 %v1581_v62, %v1499_v20 }
 0x28f   :  { %1659 = vmatpush.msrb.mxu2 %v1755_v12  ;;  %v1759_v32 = vpop.eup %1758 }
 0x290   :  { %v1761_v28 = vpop.eup %1760  ;;  %1766 = vtanh.f32 %v1626_v31 }
 0x291   :  { %1660 = vmatpush.msrb.mxu2 %v1757_v25  ;;  %v1763_v40 = vpop.eup %1762  ;;  %1768 = vtanh.f32 %v1625_v61 }
 0x292   :  { %v1765_v49 = vpop.eup %1764  ;;  %1770 = vtanh.f32 %v1624_v21 }
 0x293   :  { %1661 = vmatpush.msrb.mxu2 %v1759_v32  ;;  %1772 = vtanh.f32 %v1623_v45 }
 0x294   :  { %1774 = vtanh.f32 %v1622_v50 }
 0x295   :  { %1662 = vmatpush.msrb.mxu2 %v1761_v28  ;;  %1776 = vtanh.f32 %v1621_v26 }
 0x296   :  { %v1767_v51 = vpop.eup %1766  ;;  %1778 = vtanh.f32 %v1620_v52 }
 0x297   :  { %1663 = vmatpush.msrb.mxu2 %v1763_v40  ;;  %v1769_v42 = vpop.eup %1768  ;;  %1780 = vtanh.f32 %v1619_v41 }
 0x298   :  { %v1771_v39 = vpop.eup %1770  ;;  %1782 = vtanh.f32 %v1618_v13 }
 0x299   :  { %1664 = vmatpush.msrb.mxu2 %v1765_v49  ;;  %v1773_v1 = vpop.eup %1772 }
 0x29a   :  { %v1775_v3 = vpop.eup %1774 }
 0x29b   :  { %1665 = vmatpush.msrb.mxu2 %v1767_v51  ;;  %v1777_v16 = vpop.eup %1776 }
 0x29c   :  { %v1779_v54 = vpop.eup %1778 }
 0x29d   :  { %1666 = vmatpush.msrb.mxu2 %v1769_v42  ;;  %v1781_v59 = vpop.eup %1780 }
 0x29e   :  { %v1783_v55 = vpop.eup %1782 }
 0x29f   :  { %1667 = vmatpush.msrb.mxu2 %v1771_v39 }
 0x2a1   :  { %1668 = vmatpush.msrb.mxu2 %v1773_v1 }
 0x2a3   :  { %1669 = vmatpush.msrb.mxu2 %v1775_v3 }
 0x2a5   :  { %1670 = vmatpush.msrb.mxu2 %v1777_v16 }
 0x2a7   :  { %1671 = vmatpush.msrb.mxu2 %v1779_v54 }
 0x2a9   :  { %1672 = vmatpush.msrb.mxu2 %v1781_v59 }
 0x2ab   :  { %1673 = vmatpush.msrb.mxu2 %v1783_v55 }
 0x2ac   :  { %1674 = vmatmul.f32.vlgmr.msrb.gmra.mxu2 %v1650_v37 }
 0x32f   :  { %v1675_v60 = vpop.f32.mrf.mxu2 }
 0x330   :  { %v1676_v46 = vadd.f32 %v1675_v60, %v1657_v58 }
 0x332   :  { %v1738_v0 = vmul.f32 -1.442695, %v1676_v46 }
 0x334   :  { %1784 = vpow2.f32 %v1738_v0 }
 0x33a   :  { %v1785_v4 = vpop.eup %1784 }
 0x33b   :  { %v1681_v7 = vadd.f32 1.0, %v1785_v4 }
 0x33d   :  { %1786 = vrcp.f32 %v1681_v7  ;;  %v1693_v18 = vand.u32 2147483648, %v1681_v7  ;;  %v1691_v44 = vand.u32 2147483647, %v1681_v7  ;;  %vm1687_vm15 = vweird.f32 %v1681_v7 }
 0x33f   :  { %v1694_v62 = vor.u32 1.1754944e-38, %v1693_v18  ;;  %vm1692_vm1 = vcmp.eq.f32.partialorder %v1691_v44, 8.507059e+37 }
 0x343   :  { %v1787_v57 = vpop.eup %1786 }
 0x344   :  { %v1683_v63 = vmul.f32 %v1787_v57, %v1681_v7  ;;  %vm1688_vm11 = vweird.f32 %v1787_v57 }
 0x345   :  { %vm1689_vm0 = vmor %vm1687_vm15, %vm1688_vm11 }
 0x346   :  { %v1684_v33 = vsub.f32 1.0, %v1683_v63 }
 0x348   :  { %v1685_v34 = vmul.f32 %v1787_v57, %v1684_v33 }
 0x34a   :  { %v1686_v56 = vadd.f32 %v1787_v57, %v1685_v34 }
 0x34c   :  { %v1690_v48 = vsel %vm1689_vm0, %v1787_v57, %v1686_v56 }
 0x34d   :  { %v1695_v6 = vsel %vm1692_vm1, %v1694_v62, %v1690_v48 }
 0x34e   :  { %1697 = vst [vmem:[%s2878_s8] sm:$0x1] %v1695_v6 }

</bundles_post_ra>
